<compile_context>
chip_gen: v7x
topology: tpu7x:2x2x1
jax: 0.10.0
libtpu: 0.0.40
codegen_flags: <defaults>
</compile_context>

<pallas_src>
import functools

import jax
import jax.numpy as jnp
import numpy as np
from jax.experimental import pallas as pl
from jax.experimental.pallas import tpu as pltpu

LANE = 128


def _round_up(x, m):
    return (x + m - 1) // m * m


def _choose_tile_b(b_pad, seq_len_pad, target_rows=1024):
    """Pick a batch tile: big enough to fill the MXU M dim and amortize the
    ~0.35us per-grid-step overhead, but keep >= 2 grid steps when possible so
    the ("parallel",) batch axis can shard across the two v7x TensorCores."""
    tile = _round_up(max(1, target_rows // seq_len_pad), 8)
    tile = min(tile, b_pad)
    if b_pad >= 16:
        tile = min(tile, max(8, (b_pad // 2) // 8 * 8))
    while b_pad % tile != 0:          # b_pad and tile are multiples of 8
        tile -= 8
    return max(tile, 8)


# ----------------------------------------------------------------------------
# Fused kernel: embedding + all convs + ReLU + max-pool + linear per tile.
# ----------------------------------------------------------------------------
def _textcnn_fused_kernel(tok_ref, table_ref, conv_w_ref, conv_b_ref,
                          mask_ref, fc_w_ref, fc_b_ref, out_ref):
    tile_b, seq_len = tok_ref.shape           # (tileB, Lp) int32
    vp, ep = table_ref.shape                  # (Vp, Ep)    bf16
    nfp = conv_w_ref.shape[-1]                # n_banks * 128
    max_fs = conv_w_ref.shape[0] // ep
    rows = tile_b * seq_len

    # --- Embedding lookup as a one-hot bf16 MXU matmul (exact row select). ---
    tok = tok_ref[...]
    vocab_iota = jax.lax.broadcasted_iota(jnp.int32, (tile_b, seq_len, vp), 2)
    onehot = (vocab_iota == tok[:, :, None]).astype(jnp.bfloat16)
    onehot = onehot.reshape(rows, vp)
    emb = jax.lax.dot_general(
        onehot, table_ref[...],
        dimension_numbers=(((1,), (0,)), ((), ())),
        preferred_element_type=jnp.float32)                      # (rows, Ep) f32

    # --- im2col-lite: stack the max_fs shifted copies along the feature axis.
    # Rolled row i holds emb[(i + k) mod rows]; wrapped rows only hit time
    # positions that get masked below.
    cols = [emb.astype(jnp.bfloat16)]
    for k in range(1, max_fs):
        cols.append(pltpu.roll(emb, shift=rows - k, axis=0).astype(jnp.bfloat16))
    x_cat = jnp.concatenate(cols, axis=1)                        # (rows, max_fs*Ep)

    # --- Every filter bank in ONE matmul: K = max_fs*Ep, N = n_banks*128. ---
    conv = jax.lax.dot_general(
        x_cat, conv_w_ref[...],
        dimension_numbers=(((1,), (0,)), ((), ())),
        preferred_element_type=jnp.float32)                      # (rows, NFp) f32
    conv = jnp.maximum(conv + conv_b_ref[...], 0.0)              # bias + ReLU

    # Zero invalid time positions (per-bank threshold baked into the host-side
    # mask), then global max-pool over time.  Exact because post-ReLU >= 0.
    conv = conv.reshape(tile_b, seq_len, nfp) * mask_ref[...][None]
    pooled = jnp.max(conv, axis=1)                               # (tileB, NFp)

    # --- Final linear folded in: one (tileB, NFp) @ (NFp, Cp) matmul. ---
    logits = jax.lax.dot_general(
        pooled.astype(jnp.bfloat16), fc_w_ref[...],
        dimension_numbers=(((1,), (0,)), ((), ())),
        preferred_element_type=jnp.float32)                      # (tileB, Cp) f32
    out_ref[...] = (logits + fc_b_ref[...]).astype(out_ref.dtype)


# ----------------------------------------------------------------------------
# Host-side parameter conversion (PyTorch layouts -> padded merged layouts).
# ----------------------------------------------------------------------------
def _prepare_kernel_params(params, filter_sizes, seq_len, seq_len_pad):
    num_filters = params[f"conv{filter_sizes[0]}_w"].shape[0]
    num_classes = params["fc_w"].shape[0]
    vocab, emb_dim = params["embedding"].shape
    n = len(filter_sizes)
    max_fs = max(filter_sizes)

    fp = _round_up(num_filters, LANE)
    cp = _round_up(num_classes, LANE)
    ep = _round_up(emb_dim, 8)
    vp = _round_up(vocab, LANE)
    nfp = n * fp

    # Embedding table, zero-padded, bf16.
    table = jnp.pad(params["embedding"],
                    ((0, vp - vocab), (0, ep - emb_dim))).astype(jnp.bfloat16)

    # Merged conv weight (max_fs*Ep, n*Fp): tap-k block rows, bank-i lane block.
    conv_w = jnp.zeros((max_fs * ep, nfp), jnp.float32)
    conv_b = jnp.zeros((1, nfp), jnp.float32)
    fc_w = jnp.zeros((nfp, cp), jnp.float32)
    mask_cols = []
    t = jnp.arange(seq_len_pad, dtype=jnp.int32)[:, None]        # (Lp, 1)
    for i, fs in enumerate(filter_sizes):
        w = params[f"conv{fs}_w"]                 # (F, E, fs)  PyTorch Conv1d layout
        b = params[f"conv{fs}_b"]                 # (F,)
        for k in range(fs):
            tap = jnp.transpose(w[:, :, k])       # (E, F)
            conv_w = conv_w.at[k * ep:k * ep + emb_dim,
                               i * fp:i * fp + num_filters].set(tap)
        conv_b = conv_b.at[0, i * fp:i * fp + num_filters].set(b)

        fc_chunk = jnp.transpose(
            params["fc_w"][:, i * num_filters:(i + 1) * num_filters])   # (F, C)
        fc_w = fc_w.at[i * fp:i * fp + num_filters, :num_classes].set(fc_chunk)

        valid = (t < (seq_len - fs + 1)).astype(jnp.float32)      # (Lp, 1)
        mask_cols.append(jnp.broadcast_to(valid, (seq_len_pad, fp)))

    fc_b = jnp.zeros((1, cp), jnp.float32).at[0, :num_classes].set(params["fc_b"])
    mask = jnp.concatenate(mask_cols, axis=1)                     # (Lp, n*Fp) f32

    return {
        "table": table,
        "conv_w": conv_w.astype(jnp.bfloat16),
        "conv_b": conv_b,
        "mask": mask,
        "fc_w": fc_w.astype(jnp.bfloat16),
        "fc_b": fc_b,
        "cp": cp,
    }


# ----------------------------------------------------------------------------
# Full TextCNN forward (eval mode).
# ----------------------------------------------------------------------------
def textcnn_forward(tokens, params, filter_sizes):
    B, L = tokens.shape
    num_classes = params["fc_b"].shape[0]
    assert max(filter_sizes) <= L, "filter size larger than sequence length"

    L_pad = _round_up(L, 8)
    B_pad = _round_up(B, 8)
    tile_b = _choose_tile_b(B_pad, L_pad)
    grid = (B_pad // tile_b,)

    tokens_p = jnp.pad(tokens.astype(jnp.int32),
                       ((0, B_pad - B), (0, L_pad - L)))

    kp = _prepare_kernel_params(params, filter_sizes, L, L_pad)
    cp = kp["cp"]

    in_specs = [
        pl.BlockSpec((tile_b, L_pad), lambda i: (i, 0)),          # tokens
        pl.BlockSpec(kp["table"].shape, lambda i: (0, 0)),        # emb table
        pl.BlockSpec(kp["conv_w"].shape, lambda i: (0, 0)),       # merged conv w
        pl.BlockSpec(kp["conv_b"].shape, lambda i: (0, 0)),       # merged conv b
        pl.BlockSpec(kp["mask"].shape, lambda i: (0, 0)),         # time mask
        pl.BlockSpec(kp["fc_w"].shape, lambda i: (0, 0)),         # stacked fc w
        pl.BlockSpec(kp["fc_b"].shape, lambda i: (0, 0)),         # fc b
    ]

    logits_padded = pl.pallas_call(
        _textcnn_fused_kernel,
        out_shape=jax.ShapeDtypeStruct((B_pad, cp), jnp.bfloat16),
        grid=grid,
        in_specs=in_specs,
        out_specs=pl.BlockSpec((tile_b, cp), lambda i: (i, 0)),
        compiler_params=pltpu.CompilerParams(
            dimension_semantics=("parallel",),
            vmem_limit_bytes=32 * 1024 * 1024),
    )(tokens_p, kp["table"], kp["conv_w"], kp["conv_b"], kp["mask"],
      kp["fc_w"], kp["fc_b"])

    # Dropout: identity in eval/inference mode.
    # TODO(synk): training-mode dropout (random mask + 1/(1-p) scaling).
    return logits_padded[:B, :num_classes].astype(jnp.float32)


# ----------------------------------------------------------------------------
# Pure-JAX reference (f32), params in PyTorch layout.
# ----------------------------------------------------------------------------
def textcnn_reference(tokens, params, filter_sizes):
    emb = jnp.take(params["embedding"], tokens, axis=0)      # (B, L, E) f32
    L = emb.shape[1]
    pools = []
    for fs in filter_sizes:
        w = params[f"conv{fs}_w"]                            # (F, E, fs)
        b = params[f"conv{fs}_b"]                            # (F,)
        lout = L - fs + 1
        conv = sum(jnp.einsum("ble,fe->blf", emb[:, k:k + lout, :], w[:, :, k])
                   for k in range(fs)) + b[None, None, :]
        conv = jnp.maximum(conv, 0.0)
        pools.append(jnp.max(conv, axis=1))                  # (B, F)
    feat = jnp.concatenate(pools, axis=1)
    return feat @ params["fc_w"].T + params["fc_b"][None, :]


def init_params(key, vocab_size, embedding_dim, num_filters, filter_sizes,
                num_classes):
    keys = jax.random.split(key, 3 + 2 * len(filter_sizes))
    params = {"embedding": jax.random.normal(
        keys[0], (vocab_size, embedding_dim), jnp.float32) * 0.1}
    for i, fs in enumerate(filter_sizes):
        # PyTorch nn.Conv1d weight layout: (out_channels, in_channels, kernel)
        params[f"conv{fs}_w"] = jax.random.normal(
            keys[1 + 2 * i], (num_filters, embedding_dim, fs), jnp.float32) * 0.1
        params[f"conv{fs}_b"] = jax.random.normal(
            keys[2 + 2 * i], (num_filters,), jnp.float32) * 0.1
    d_in = num_filters * len(filter_sizes)
    params["fc_w"] = jax.random.normal(keys[-2], (num_classes, d_in),
                                       jnp.float32) * 0.1
    params["fc_b"] = jax.random.normal(keys[-1], (num_classes,),
                                       jnp.float32) * 0.1
    return params


if __name__ == "__main__":
    vocab_size = 50
    embedding_dim = 32
    num_filters = 16
    filter_sizes = (2, 3, 4)
    num_classes = 8
    batch = 16
    seq_len = 16

    key = jax.random.PRNGKey(0)
    k_tok, k_par = jax.random.split(key)
    tokens = jax.random.randint(k_tok, (batch, seq_len), 0, vocab_size, jnp.int32)
    params = init_params(k_par, vocab_size, embedding_dim, num_filters,
                         filter_sizes, num_classes)

    fwd = jax.jit(functools.partial(textcnn_forward, filter_sizes=filter_sizes))
    out = fwd(tokens, params)
    jax.block_until_ready(out)
    assert out.shape == (batch, num_classes)

    ref = textcnn_reference(tokens, params, filter_sizes)
    np.testing.assert_allclose(np.asarray(out), np.asarray(ref),
                               atol=2e-2, rtol=2e-2)

    print("KERNEL_OK")
</pallas_src>

<mosaic_0001>
module attributes {stable_mosaic.version = 11 : i64} {
  func.func @_textcnn_fused_kernel(%arg0: i32, %arg1: memref<8x16xi32, #tpu.memory_space<vmem>>, %arg2: memref<128x32xbf16, #tpu.memory_space<vmem>>, %arg3: memref<128x384xbf16, #tpu.memory_space<vmem>>, %arg4: memref<1x384xf32, #tpu.memory_space<vmem>>, %arg5: memref<16x384xf32, #tpu.memory_space<vmem>>, %arg6: memref<384x128xbf16, #tpu.memory_space<vmem>>, %arg7: memref<1x128xf32, #tpu.memory_space<vmem>>, %arg8: memref<8x128xbf16, #tpu.memory_space<vmem>>) attributes {dimension_semantics = [#tpu.dimension_semantics<parallel>], iteration_bounds = array<i64: 2>, scalar_prefetch = 0 : i64, scratch_operands = 0 : i64, tpu.core_type = #tpu.core_type<tc>, window_params = [{transform_indices = @transform_0, window_bounds = array<i64: 8, 16>}, {pipeline_mode = #tpu.pipeline_mode<synchronous>, transform_indices = @transform_1, window_bounds = array<i64: 128, 32>}, {pipeline_mode = #tpu.pipeline_mode<synchronous>, transform_indices = @transform_2, window_bounds = array<i64: 128, 384>}, {pipeline_mode = #tpu.pipeline_mode<synchronous>, transform_indices = @transform_3, window_bounds = array<i64: 1, 384>}, {pipeline_mode = #tpu.pipeline_mode<synchronous>, transform_indices = @transform_4, window_bounds = array<i64: 16, 384>}, {pipeline_mode = #tpu.pipeline_mode<synchronous>, transform_indices = @transform_5, window_bounds = array<i64: 384, 128>}, {pipeline_mode = #tpu.pipeline_mode<synchronous>, transform_indices = @transform_6, window_bounds = array<i64: 1, 128>}, {transform_indices = @transform_7, window_bounds = array<i64: 8, 128>}]} {
    %c0 = arith.constant 0 : index
    %c0_0 = arith.constant 0 : index
    %0 = vector.load %arg1[%c0, %c0_0] : memref<8x16xi32, #tpu.memory_space<vmem>>, vector<8x16xi32>
    %1 = tpu.iota {dimensions = array<i32: 2>} : vector<8x16x128xi32>
    %2 = vector.shape_cast %0 : vector<8x16xi32> to vector<8x16x1xi32>
    %3 = vector.broadcast %2 : vector<8x16x1xi32> to vector<8x16x128xi32>
    %4 = arith.cmpi eq, %1, %3 : vector<8x16x128xi32>
    %5 = arith.extui %4 : vector<8x16x128xi1> to vector<8x16x128xi32>
    %6 = arith.sitofp %5 : vector<8x16x128xi32> to vector<8x16x128xf32>
    %7 = arith.truncf %6 : vector<8x16x128xf32> to vector<8x16x128xbf16>
    %8 = vector.shape_cast %7 : vector<8x16x128xbf16> to vector<128x128xbf16>
    %c0_1 = arith.constant 0 : index
    %c0_2 = arith.constant 0 : index
    %9 = vector.load %arg2[%c0_1, %c0_2] : memref<128x32xbf16, #tpu.memory_space<vmem>>, vector<128x32xbf16>
    %cst = arith.constant dense<0.000000e+00> : vector<128x32xf32>
    %10 = tpu.matmul %8, %9, %cst {dimension_numbers = #tpu.dot_dimension_numbers<[1], [0], [0], [1], [0, 0, 1, 1], [], []>} : vector<128x128xbf16>, vector<128x32xbf16>, vector<128x32xf32> -> vector<128x32xf32>
    %11 = arith.truncf %10 : vector<128x32xf32> to vector<128x32xbf16>
    %c127_i32 = arith.constant 127 : i32
    %12 = tpu.dynamic_rotate %10 by %c127_i32 dim 0 : vector<128x32xf32>, i32 -> vector<128x32xf32>
    %13 = arith.truncf %12 : vector<128x32xf32> to vector<128x32xbf16>
    %c126_i32 = arith.constant 126 : i32
    %14 = tpu.dynamic_rotate %10 by %c126_i32 dim 0 : vector<128x32xf32>, i32 -> vector<128x32xf32>
    %15 = arith.truncf %14 : vector<128x32xf32> to vector<128x32xbf16>
    %c125_i32 = arith.constant 125 : i32
    %16 = tpu.dynamic_rotate %10 by %c125_i32 dim 0 : vector<128x32xf32>, i32 -> vector<128x32xf32>
    %17 = arith.truncf %16 : vector<128x32xf32> to vector<128x32xbf16>
    %18 = tpu.concatenate %11, %13, %15, %17 in 1 : vector<128x32xbf16>, vector<128x32xbf16>, vector<128x32xbf16>, vector<128x32xbf16> -> vector<128x128xbf16>
    %c0_3 = arith.constant 0 : index
    %c0_4 = arith.constant 0 : index
    %19 = vector.load %arg3[%c0_3, %c0_4] : memref<128x384xbf16, #tpu.memory_space<vmem>>, vector<128x384xbf16>
    %cst_5 = arith.constant dense<0.000000e+00> : vector<128x384xf32>
    %20 = tpu.matmul %18, %19, %cst_5 {dimension_numbers = #tpu.dot_dimension_numbers<[1], [0], [0], [1], [0, 0, 1, 1], [], []>} : vector<128x128xbf16>, vector<128x384xbf16>, vector<128x384xf32> -> vector<128x384xf32>
    %c0_6 = arith.constant 0 : index
    %c0_7 = arith.constant 0 : index
    %21 = vector.load %arg4[%c0_6, %c0_7] : memref<1x384xf32, #tpu.memory_space<vmem>>, vector<1x384xf32>
    %22 = vector.broadcast %21 : vector<1x384xf32> to vector<128x384xf32>
    %23 = arith.addf %20, %22 : vector<128x384xf32>
    %cst_8 = arith.constant 0.000000e+00 : f32
    %24 = vector.broadcast %cst_8 : f32 to vector<128x384xf32>
    %25 = arith.maximumf %23, %24 : vector<128x384xf32>
    %26 = vector.shape_cast %25 : vector<128x384xf32> to vector<8x16x384xf32>
    %c0_9 = arith.constant 0 : index
    %c0_10 = arith.constant 0 : index
    %27 = vector.load %arg5[%c0_9, %c0_10] : memref<16x384xf32, #tpu.memory_space<vmem>>, vector<16x384xf32>
    %28 = vector.shape_cast %27 : vector<16x384xf32> to vector<1x16x384xf32>
    %29 = vector.broadcast %28 : vector<1x16x384xf32> to vector<8x16x384xf32>
    %30 = arith.mulf %26, %29 : vector<8x16x384xf32>
    %cst_11 = arith.constant dense<0xFF800000> : vector<8x384xf32>
    %31 = vector.multi_reduction <maximumf>, %30, %cst_11 [1] : vector<8x16x384xf32> to vector<8x384xf32>
    %32 = arith.truncf %31 : vector<8x384xf32> to vector<8x384xbf16>
    %c0_12 = arith.constant 0 : index
    %c0_13 = arith.constant 0 : index
    %33 = vector.load %arg6[%c0_12, %c0_13] : memref<384x128xbf16, #tpu.memory_space<vmem>>, vector<384x128xbf16>
    %cst_14 = arith.constant dense<0.000000e+00> : vector<8x128xf32>
    %34 = tpu.matmul %32, %33, %cst_14 {dimension_numbers = #tpu.dot_dimension_numbers<[1], [0], [0], [1], [0, 0, 1, 1], [], []>} : vector<8x384xbf16>, vector<384x128xbf16>, vector<8x128xf32> -> vector<8x128xf32>
    %c0_15 = arith.constant 0 : index
    %c0_16 = arith.constant 0 : index
    %35 = vector.load %arg7[%c0_15, %c0_16] : memref<1x128xf32, #tpu.memory_space<vmem>>, vector<1x128xf32>
    %36 = vector.broadcast %35 : vector<1x128xf32> to vector<8x128xf32>
    %37 = arith.addf %34, %36 : vector<8x128xf32>
    %38 = arith.truncf %37 : vector<8x128xf32> to vector<8x128xbf16>
    %c0_17 = arith.constant 0 : index
    %c0_18 = arith.constant 0 : index
    %39 = vector.load %arg8[%c0_17, %c0_18] : memref<8x128xbf16, #tpu.memory_space<vmem>>, vector<8x128xbf16>
    tpu.vector_store %arg8[%c0_17, %c0_18], %38 {strides = array<i32>} : memref<8x128xbf16, #tpu.memory_space<vmem>>, vector<8x128xbf16>,
    return
  }
  func.func @transform_0(%arg0: i32) -> (i32, i32) {
    %c0_i32 = arith.constant 0 : i32
    %c0_i32_0 = arith.constant 0 : i32
    return %arg0, %c0_i32 : i32, i32
  }
  func.func @transform_1(%arg0: i32) -> (i32, i32) {
    %c0_i32 = arith.constant 0 : i32
    %c0_i32_0 = arith.constant 0 : i32
    %c0_i32_1 = arith.constant 0 : i32
    return %c0_i32, %c0_i32_0 : i32, i32
  }
  func.func @transform_2(%arg0: i32) -> (i32, i32) {
    %c0_i32 = arith.constant 0 : i32
    %c0_i32_0 = arith.constant 0 : i32
    %c0_i32_1 = arith.constant 0 : i32
    return %c0_i32, %c0_i32_0 : i32, i32
  }
  func.func @transform_3(%arg0: i32) -> (i32, i32) {
    %c0_i32 = arith.constant 0 : i32
    %c0_i32_0 = arith.constant 0 : i32
    %c0_i32_1 = arith.constant 0 : i32
    return %c0_i32, %c0_i32_0 : i32, i32
  }
  func.func @transform_4(%arg0: i32) -> (i32, i32) {
    %c0_i32 = arith.constant 0 : i32
    %c0_i32_0 = arith.constant 0 : i32
    %c0_i32_1 = arith.constant 0 : i32
    return %c0_i32, %c0_i32_0 : i32, i32
  }
  func.func @transform_5(%arg0: i32) -> (i32, i32) {
    %c0_i32 = arith.constant 0 : i32
    %c0_i32_0 = arith.constant 0 : i32
    %c0_i32_1 = arith.constant 0 : i32
    return %c0_i32, %c0_i32_0 : i32, i32
  }
  func.func @transform_6(%arg0: i32) -> (i32, i32) {
    %c0_i32 = arith.constant 0 : i32
    %c0_i32_0 = arith.constant 0 : i32
    %c0_i32_1 = arith.constant 0 : i32
    return %c0_i32, %c0_i32_0 : i32, i32
  }
  func.func @transform_7(%arg0: i32) -> (i32, i32) {
    %c0_i32 = arith.constant 0 : i32
    %c0_i32_0 = arith.constant 0 : i32
    return %arg0, %c0_i32 : i32, i32
  }
}

</mosaic_0001>

<bundles_post_ra>
// kernel: textcnn_forward.1
= control target key start
LH: loop header
LB: loop body
LE: loop exit
PB: predicated region body
PF: predicated region fallthrough
CT: control target
= control target key end

     0   :  { %s2331_s24 = smov 0   ;;  %s3105_s0 = inlined_call_operand.vmem [shape: s32[16,16], index: 0, kind: input, shape index: {}]   ;;  %s3106_s1 = inlined_call_operand.vmem [shape: bf16[128,32], index: 1, kind: input, shape index: {}]   ;;  %s3107_s2 = inlined_call_operand.vmem [shape: bf16[128,384], index: 2, kind: input, shape index: {}]   ;;  %s3108_s3 = inlined_call_operand.vmem [shape: f32[1,384], index: 3, kind: input, shape index: {}]   ;;  %s3109_s4 = inlined_call_operand.vmem [shape: f32[16,384], index: 4, kind: input, shape index: {}]   ;;  %s3110_s5 = inlined_call_operand.vmem [shape: bf16[384,128], index: 5, kind: input, shape index: {}]   ;;  %s3111_s6 = inlined_call_operand.vmem [shape: f32[1,128], index: 6, kind: input, shape index: {}]   ;;  %s3112_s7 = inlined_call_operand.vmem [shape: bf16[16,128], index: 7, kind: output, shape index: {}]  }
   0x1 LB: > { %s1952_s25 = sadd.s32 4294967295, %s2282_s24   ;;  %p1956_p0 = scmp.ge.s32.totalorder %s2282_s24, 1  ;;  %s2282_s24 = sphi %s2331_s24, %s17_s24  }
   0x2   : > { %p236_p1 = scmp.lt.s32.totalorder %s2282_s24, 3 }
   0x4   : > { %p237_p2 = pnand %p1956_p0, %p236_p1 }
   0x5   : > { %p266_p3 = scmp.lt.s32.totalorder (!%p237_p2), %s1952_s25, 1  ;;  %v276_v0 = vlaneseq (!%p237_p2)  ;;  %v2212_v1 = vld [vmem:[%s3106_s1] sm:$0xff] (!%p237_p2)   ;;  %v2213_v3 = vld [vmem:[%s3106_s1 + $0x8] sm:$0xff] (!%p237_p2)   ;;  %v2214_v6 = vld [vmem:[%s3106_s1 + $0x10] sm:$0xff] (!%p237_p2)   ;;  %v2284_v32 = vmov (!%p237_p2), 1.0|1.0  }
   0x6   : > { %240 = sbr.rel (%p237_p2) target bundleno = 1031 (0x407), region = 48  ;;  %2113 = vmatprep.subr.bf16.mxu0 (!%p237_p2), %v2212_v1  ;;  %v2215_v10 = vld [vmem:[%s3106_s1 + $0x18] sm:$0xff] (!%p237_p2)   ;;  %v2216_v12 = vld [vmem:[%s3106_s1 + $0x20] sm:$0xff] (!%p237_p2)   ;;  %v2217_v15 = vld [vmem:[%s3106_s1 + $0x28] sm:$0xff] (!%p237_p2)   ;;  %s2286_s8 = smov (!%p237_p2), 64  }
   0x7   : > { %v2345_v2 = vshrl.u32 (!%p237_p2), %v276_v0, 7  ;;  %2114 = vmatpush3.bf16.msra.mxu0 (!%p237_p2), %v2212_v1  ;;  %v2218_v19 = vld [vmem:[%s3106_s1 + $0x30] sm:$0xff] (!%p237_p2)   ;;  %v2219_v23 = vld [vmem:[%s3106_s1 + $0x38] sm:$0xff] (!%p237_p2)   ;;  %v277_v29 = vand.u32 (!%p237_p2), 127, %v276_v0  ;;  %v2222_v46 = vld [vmem:[%s3107_s2] ss:$12 sps:$4 sm:$0xff] (!%p237_p2)  }
   0x8   : > { %2115 = vmatprep.subr.bf16.mxu0 (!%p237_p2), %v2213_v3  ;;  %v2220_v45 = vld [vmem:[%s3107_s2 + $0x4] ss:$12 sps:$4 sm:$0xff] (!%p237_p2)   ;;  %v2223_v47 = vld [vmem:[%s3107_s2 + $0x1c] ss:$12 sps:$4 sm:$0xff] (!%p237_p2)   ;;  %v2230_v49 = vld [vmem:[%s3107_s2 + $0x20] ss:$12 sps:$4 sm:$0xff] (!%p237_p2)  }
   0x9   : > { %v291_v4 = vsub.s32 (!%p237_p2), 1, %v2345_v2  ;;  %v280_v5 = vsub.s32 (!%p237_p2), 0, %v2345_v2  ;;  %v302_v11 = vsub.s32 (!%p237_p2), 2, %v2345_v2  ;;  %v313_v13 = vsub.s32 (!%p237_p2), 3, %v2345_v2  ;;  %v2226_v48 = vld [vmem:[%s3107_s2 + $0x8] ss:$12 sps:$4 sm:$0xff] (!%p237_p2)   ;;  %1032 = vmatprep.subr.bf16.mxu1 (!%p237_p2), %v2220_v45 }
   0xa   : > { %v324_v16 = vsub.s32 (!%p237_p2), 4, %v2345_v2  ;;  %v335_v18 = vsub.s32 (!%p237_p2), 5, %v2345_v2  ;;  %v346_v20 = vsub.s32 (!%p237_p2), 6, %v2345_v2  ;;  %v357_v21 = vsub.s32 (!%p237_p2), 7, %v2345_v2  ;;  %1033 = vmatpush1.bf16.msra.mxu1 (!%p237_p2), %v2222_v46  ;;  %v2225_v50 = vld [vmem:[%s3107_s2 + $0x18] ss:$12 sps:$4 sm:$0xff] (!%p237_p2)  }
   0xb   : > { %2116 = vmatpush3.bf16.msra.mxu0 (!%p237_p2), %v2213_v3  ;;  %1034 = vmatprep.subr.bf16.mxu1 (!%p237_p2), %v2223_v47  ;;  %v2227_v51 = vld [vmem:[%s3107_s2 + $0x34] ss:$12 sps:$4 sm:$0xff] (!%p237_p2)   ;;  %v2234_v52 = vld [vmem:[%s3107_s2 + $0x38] ss:$12 sps:$4 sm:$0xff] (!%p237_p2)   ;;  %v2229_v53 = vld [vmem:[%s3107_s2 + $0x30] ss:$12 sps:$4 sm:$0xff] (!%p237_p2)  }
   0xc   : > { %2117 = vmatprep.subr.bf16.mxu0 (!%p237_p2), %v2214_v6  ;;  %v2231_v54 = vld [vmem:[%s3107_s2 + $0x4c] ss:$12 sps:$4 sm:$0xff] (!%p237_p2)   ;;  %v2238_v55 = vld [vmem:[%s3107_s2 + $0x50] ss:$12 sps:$4 sm:$0xff] (!%p237_p2)   ;;  %v2233_v56 = vld [vmem:[%s3107_s2 + $0x48] ss:$12 sps:$4 sm:$0xff] (!%p237_p2)  }
   0xd   : > { %s3114_s25 = smov (!%p266_p3, %s1952_s25), 1  ;;  %v2235_v57 = vld [vmem:[%s3107_s2 + $0x64] ss:$12 sps:$4 sm:$0xff]   ;;  %v2242_v58 = vld [vmem:[%s3107_s2 + $0x68] ss:$12 sps:$4 sm:$0xff]   ;;  %s2287_s9 = smov 32  }
   0xe   : > { %s1957_s30 = sshll.u32 %s3114_s25, 3  ;;  %1035 = vmatpush1.bf16.msra.mxu1 %v2225_v50  ;;  %v2237_v59 = vld [vmem:[%s3107_s2 + $0x60] ss:$12 sps:$4 sm:$0xff]   ;;  %v2239_v60 = vld [vmem:[%s3107_s2 + $0x7c] ss:$12 sps:$4 sm:$0xff]   ;;  %s2288_s10 = smov 96  }
   0xf   : > { %s269_s12 = scalar_lea.vmem %s3105_s0, %s1957_s30  ;;  %2118 = vmatpush3.bf16.msra.mxu0 %v2214_v6  ;;  %1036 = vmatprep.subr.bf16.mxu1 %v2227_v51  ;;  %v2246_v61 = vld [vmem:[%s3107_s2 + $0x80] ss:$12 sps:$4 sm:$0xff]   ;;  %v2241_v62 = vld [vmem:[%s3107_s2 + $0x78] ss:$12 sps:$4 sm:$0xff]   ;;  %v2245_v0 = vld [vmem:[%s3107_s2 + $0x90] ss:$12 sps:$4 sm:$0xff]  }
  0x10   : > { %v275_v7 = vld [vmem:[%s269_s12] sm:$0xff]  ;;  %2119 = vmatprep.subr.bf16.mxu0 %v2215_v10  ;;  %v2247_v1 = vld [vmem:[%s3107_s2 + $0xac] ss:$12 sps:$4 sm:$0xff]   ;;  %v2249_v3 = vld [vmem:[%s3107_s2 + $0xa8] ss:$12 sps:$4 sm:$0xff]   ;;  %s1958_s12 = sshll.u32 %s3114_s25, 2 }
  0x11   : > { %v292_v8 = vrot.slane %v275_v7, %v291_v4  ;;  %v281_v9 = vrot.slane %v275_v7, %v280_v5  ;;  %v303_v14 = vrot.slane %v275_v7, %v302_v11  ;;  %v314_v17 = vrot.slane %v275_v7, %v313_v13  ;;  %v2243_v63 = vld [vmem:[%s3107_s2 + $0x94] ss:$12 sps:$4 sm:$0xff]   ;;  %v2250_v6 = vld [vmem:[%s3107_s2 + $0x98] ss:$12 sps:$4 sm:$0xff]   ;;  %s273_s15 = scalar_lea.vmem %s3112_s7, %s1958_s12 }
  0x12   : > { %v325_v22 = vrot.slane %v275_v7, %v324_v16  ;;  %v336_v24 = vrot.slane %v275_v7, %v335_v18  ;;  %v347_v25 = vrot.slane %v275_v7, %v346_v20  ;;  %v358_v26 = vrot.slane %v275_v7, %v357_v21  ;;  %1037 = vmatpush1.bf16.msra.mxu1 %v2229_v53 }
  0x13   : > { %294 = vbcast.lane.b32.xlu1 %v292_v8, 256  ;;  %283 = vbcast.lane.b32.xlu0 %v281_v9, 256 }
  0x14   : > { %2120 = vmatpush3.bf16.msra.mxu0 %v2215_v10  ;;  %1038 = vmatprep.subr.bf16.mxu1 %v2231_v54 }
  0x15   : > { %2121 = vmatprep.subr.bf16.mxu0 %v2216_v12 }
  0x16   : > { %1039 = vmatpush1.bf16.msra.mxu1 %v2233_v56 }
  0x17   : > { %298 = vbcast.lane.b32.xlu1 %v292_v8, 264  ;;  %287 = vbcast.lane.b32.xlu0 %v281_v9, 264  ;;  %v2285_v8 = vmov 0  }
  0x18   : > { %2122 = vmatpush3.bf16.msra.mxu0 %v2216_v12  ;;  %1040 = vmatprep.subr.bf16.mxu1 %v2235_v57 }
  0x19   : > { %2123 = vmatprep.subr.bf16.mxu0 %v2217_v15  ;;  %1064 = vmatprep.mubr.bf16.mxu1 %v2285_v8 }
  0x1a   : > { %1041 = vmatpush1.bf16.msra.mxu1 %v2237_v59 }
  0x1b   : > { %309 = vbcast.lane.b32.xlu1 %v303_v14, 264  ;;  %305 = vbcast.lane.b32.xlu0 %v303_v14, 256 }
  0x1c   : > { %2124 = vmatpush3.bf16.msra.mxu0 %v2217_v15  ;;  %1042 = vmatprep.subr.bf16.mxu1 %v2239_v60 }
  0x1d   : > { %2125 = vmatprep.subr.bf16.mxu0 %v2218_v19 }
  0x1e   : > { %1043 = vmatpush1.bf16.msra.mxu1 %v2241_v62 }
  0x1f   : > { %320 = vbcast.lane.b32.xlu1 %v314_v17, 264  ;;  %316 = vbcast.lane.b32.xlu0 %v314_v17, 256 }
  0x20   : > { %2126 = vmatpush3.bf16.msra.mxu0 %v2218_v19  ;;  %1044 = vmatprep.subr.bf16.mxu1 %v2243_v63 }
  0x21   : > { %2127 = vmatprep.subr.bf16.mxu0 %v2219_v23 }
  0x22   : > { %1045 = vmatpush1.bf16.msra.mxu1 %v2245_v0 }
  0x23   : > { %331 = vbcast.lane.b32.xlu1 %v325_v22, 264  ;;  %327 = vbcast.lane.b32.xlu0 %v325_v22, 256  ;;  %v2251_v22 = vld [vmem:[%s3107_s2 + $0xb0] ss:$12 sps:$4 sm:$0xff]  }
  0x24   : > { %2128 = vmatpush3.bf16.msra.mxu0 %v2219_v23  ;;  %1046 = vmatprep.subr.bf16.mxu1 %v2247_v1 }
  0x25   : > { %2145 = vmatprep.subr.bf16.mxu0 %v2226_v48 }
  0x26   : > { %1047 = vmatpush1.bf16.msra.mxu1 %v2249_v3 }
  0x27   : > { %342 = vbcast.lane.b32.xlu1 %v336_v24, 264  ;;  %338 = vbcast.lane.b32.xlu0 %v336_v24, 256 }
  0x2b   : > { %353 = vbcast.lane.b32.xlu1 %v347_v25, 264  ;;  %349 = vbcast.lane.b32.xlu0 %v347_v25, 256 }
  0x2f   : > { %364 = vbcast.lane.b32.xlu1 %v358_v26, 264  ;;  %360 = vbcast.lane.b32.xlu0 %v358_v26, 256 }
  0x85   : > { %v295_v27 = vpop.permute.xlu1 %294  ;;  %v284_v28 = vpop.permute.xlu0 %283 }
  0x86   : > { %vm368_vm0 = vcmp.eq.s32.totalorder %v277_v29, %v295_v27  ;;  %vm366_vm3 = vcmp.eq.s32.totalorder %v277_v29, %v284_v28 }
  0x89   : > { %v299_v30 = vpop.permute.xlu1 %298  ;;  %v288_v31 = vpop.permute.xlu0 %287 }
  0x8a   : > { %vm369_vm1 = vcmp.eq.s32.totalorder %v277_v29, %v299_v30  ;;  %vm367_vm2 = vcmp.eq.s32.totalorder %v277_v29, %v288_v31 }
  0x8b   : > { %vm1985_vm4 = vmpackc.low %vm369_vm1, %vm368_vm0 }
  0x8c   : > { %vm1983_vm5 = vmpackc.low %vm367_vm2, %vm366_vm3 }
  0x8d   : > { %2129 = vmatprep.mubr.msk.bf16.mxu0 %vm1983_vm5, %v2284_v32  ;;  %v310_v33 = vpop.permute.xlu1 %309  ;;  %v306_v34 = vpop.permute.xlu0 %305 }
  0x8e   : > { %2130 = vmatmul.mubr.msk.bf16.vlgmr.msra.gmra.mrb[0].mxu0 %vm1985_vm4, %v2284_v32  ;;  %vm371_vm6 = vcmp.eq.s32.totalorder %v277_v29, %v310_v33  ;;  %vm370_vm7 = vcmp.eq.s32.totalorder %v277_v29, %v306_v34 }
  0x8f   : > { %vm1987_vm8 = vmpackc.low %vm371_vm6, %vm370_vm7  ;;  %2146 = vmatpush3.bf16.msra.mxu0 %v2226_v48 }
  0x90   : > { %2133 = vmatprep.mubr.msk.bf16.mxu0 %vm1987_vm8, %v2284_v32  ;;  %2147 = vmatprep.subr.bf16.mxu0 %v2230_v49  ;;  %vm650_vm8 = vcmp.lt.s32.totalorder %v2345_v2, 6 }
  0x91   : > { %v321_v35 = vpop.permute.xlu1 %320  ;;  %v317_v36 = vpop.permute.xlu0 %316 }
  0x92   : > { %vm373_vm9 = vcmp.eq.s32.totalorder %v277_v29, %v321_v35  ;;  %vm372_vm10 = vcmp.eq.s32.totalorder %v277_v29, %v317_v36 }
  0x93   : > { %vm1989_vm11 = vmpackc.low %vm373_vm9, %vm372_vm10  ;;  %2148 = vmatpush3.bf16.msra.mxu0 %v2230_v49  ;;  %vm609_vm9 = vcmp.lt.s32.totalorder %v2345_v2, 7  ;;  %vm691_vm10 = vcmp.lt.s32.totalorder %v2345_v2, 5 }
  0x94   : > { %2149 = vmatprep.subr.bf16.mxu0 %v2234_v52 }
  0x95   : > { %v332_v37 = vpop.permute.xlu1 %331  ;;  %v328_v38 = vpop.permute.xlu0 %327 }
  0x96   : > { %2134 = vmatmul.mubr.msk.bf16.gmra.mrb[4].mxu0 %vm1989_vm11, %v2284_v32  ;;  %vm375_vm12 = vcmp.eq.s32.totalorder %v277_v29, %v332_v37  ;;  %vm374_vm13 = vcmp.eq.s32.totalorder %v277_v29, %v328_v38  ;;  %vm788_vm11 = vcmask 261120  }
  0x97   : > { %vm1991_vm14 = vmpackc.low %vm375_vm12, %vm374_vm13  ;;  %2150 = vmatpush3.bf16.msra.mxu0 %v2234_v52  ;;  %vm813_vm12 = vcmask 523264   ;;  %vm830_vm13 = vcmask 785408  }
  0x98   : > { %2137 = vmatprep.mubr.msk.bf16.mxu0 %vm1991_vm14, %v2284_v32  ;;  %2151 = vmatprep.subr.bf16.mxu0 %v2238_v55  ;;  %vm2290_vm14 = vmmov 0  }
  0x99   : > { %v343_v39 = vpop.permute.xlu1 %342  ;;  %v339_v40 = vpop.permute.xlu0 %338 }
  0x9a   : > { %vm377_vm15 = vcmp.eq.s32.totalorder %v277_v29, %v343_v39  ;;  %vm376_vm0 = vcmp.eq.s32.totalorder %v277_v29, %v339_v40 }
  0x9b   : > { %vm1993_vm1 = vmpackc.low %vm377_vm15, %vm376_vm0  ;;  %2152 = vmatpush3.bf16.msra.mxu0 %v2238_v55  ;;  %vm1639_vm15 = vcmask 1041409   ;;  %vm1641_vm0 = vcmask 1042434  }
  0x9c   : > { %2153 = vmatprep.subr.bf16.mxu0 %v2242_v58 }
  0x9d   : > { %v354_v41 = vpop.permute.xlu1 %353  ;;  %v350_v42 = vpop.permute.xlu0 %349 }
  0x9e   : > { %2138 = vmatmul.mubr.msk.bf16.gmra.mrb[8].mxu0 %vm1993_vm1, %v2284_v32  ;;  %vm379_vm2 = vcmp.eq.s32.totalorder %v277_v29, %v354_v41  ;;  %vm378_vm3 = vcmp.eq.s32.totalorder %v277_v29, %v350_v42  ;;  %vm1643_vm1 = vcmask 1043459  }
  0x9f   : > { %vm1995_vm4 = vmpackc.low %vm379_vm2, %vm378_vm3  ;;  %2154 = vmatpush3.bf16.msra.mxu0 %v2242_v58  ;;  %vm1645_vm2 = vcmask 1044484   ;;  %vm1647_vm3 = vcmask 1045509  }
  0xa0   : > { %2141 = vmatprep.mubr.msk.bf16.mxu0 %vm1995_vm4, %v2284_v32  ;;  %2155 = vmatprep.subr.bf16.mxu0 %v2246_v61  ;;  %vm1649_vm4 = vcmask 1046534  }
  0xa1   : > { %v365_v43 = vpop.permute.xlu1 %364  ;;  %v361_v44 = vpop.permute.xlu0 %360 }
  0xa2   : > { %vm381_vm5 = vcmp.eq.s32.totalorder %v277_v29, %v365_v43  ;;  %vm380_vm6 = vcmp.eq.s32.totalorder %v277_v29, %v361_v44 }
  0xa3   : > { %vm1997_vm7 = vmpackc.low %vm381_vm5, %vm380_vm6  ;;  %2156 = vmatpush3.bf16.msra.mxu0 %v2246_v61  ;;  %vm1651_vm5 = vcmask 1047559  }
  0xa4   : > { %2157 = vmatprep.subr.bf16.mxu0 %v2250_v6 }
  0xa6   : > { %2142 = vmatmul.mubr.msk.bf16.gmra.mrb[12].mxu0 %vm1997_vm7, %v2284_v32 }
  0xa7   : > { %2158 = vmatpush3.bf16.msra.mxu0 %v2250_v6 }
  0xa8   : > { %2159 = vmatprep.subr.bf16.mxu0 %v2251_v22 }
  0xab   : > { %2160 = vmatpush3.bf16.msra.mxu0 %v2251_v22 }
 0x161   : > { %v2456_v7 = vpop.f32.mrb[0].mxu0 }
 0x162   : > { %v593_v9 = vrot.slane %v2456_v7, 1  ;;  %v2460_v10 = vpop.f32.mrb[1].mxu0  ;;  %v636_v12 = vrot.slane %v2456_v7, 2  ;;  %v677_v13 = vrot.slane %v2456_v7, 3 }
 0x163   : > { %v591_v14 = vrot.slane %v2460_v10, 1  ;;  %v634_v15 = vrot.slane %v2460_v10, 2  ;;  %v2469_v16 = vpop.f32.mrb[2].mxu0  ;;  %v675_v27 = vrot.slane %v2460_v10, 3 }
 0x164   : > { %v584_v17 = vpack.c.bf16 %v2469_v16, %v2456_v7  ;;  %v594_v18 = vrot.slane %v2469_v16, 1  ;;  %v637_v19 = vrot.slane %v2469_v16, 2  ;;  %v678_v20 = vrot.slane %v2469_v16, 3  ;;  %v2476_v21 = vpop.f32.mrb[3].mxu0 }
 0x165   : > { %v583_v23 = vpack.c.bf16 %v2476_v21, %v2460_v10  ;;  %v592_v24 = vrot.slane %v2476_v21, 1  ;;  %v635_v25 = vrot.slane %v2476_v21, 2  ;;  %v676_v26 = vrot.slane %v2476_v21, 3 }
 0x166   : > { %v622_v28 = vsel %vm609_vm9, %v593_v9, %v594_v18  ;;  %v663_v29 = vsel %vm650_vm8, %v636_v12, %v637_v19  ;;  %v2493_v30 = vsel %vm691_vm10, %v677_v13, %v678_v20 }
 0x167   : > { %v664_v31 = vsel %vm650_vm8, %v635_v25, %v636_v12  ;;  %v665_v32 = vsel %vm650_vm8, %v634_v15, %v635_v25  ;;  %v623_v33 = vsel %vm609_vm9, %v592_v24, %v593_v9  ;;  %v624_v34 = vsel %vm609_vm9, %v591_v14, %v592_v24 }
 0x168   : > { %v667_v35 = vpack.c.bf16 %v664_v31, %v665_v32  ;;  %v626_v36 = vpack.c.bf16 %v623_v33, %v624_v34  ;;  %v705_v37 = vsel %vm691_vm10, %v676_v26, %v677_v13  ;;  %v706_v38 = vsel %vm691_vm10, %v675_v27, %v676_v26 }
 0x169   : > { %v2513_v39 = vpop.f32.mrb[4].mxu0  ;;  %v708_v40 = vpack.c.bf16 %v705_v37, %v706_v38 }
 0x16a   : > { %v597_v41 = vrot.slane %v2513_v39, 1  ;;  %v640_v42 = vrot.slane %v2513_v39, 2  ;;  %748 = vrot.lane.b32.xlu1 %v667_v35, %s2286_s8  ;;  %724 = vrot.lane.b32.xlu0 %v626_v36, %s2287_s9  ;;  %v2519_v43 = vpop.f32.mrb[5].mxu0  ;;  %v681_v44 = vrot.slane %v2513_v39, 3 }
 0x16b   : > { %v595_v45 = vrot.slane %v2519_v43, 1  ;;  %v638_v46 = vrot.slane %v2519_v43, 2  ;;  %v679_v47 = vrot.slane %v2519_v43, 3  ;;  %v2525_v48 = vpop.f32.mrb[6].mxu0 }
 0x16c   : > { %v586_v49 = vpack.c.bf16 %v2525_v48, %v2513_v39  ;;  %v598_v50 = vrot.slane %v2525_v48, 1  ;;  %v641_v51 = vrot.slane %v2525_v48, 2  ;;  %v682_v52 = vrot.slane %v2525_v48, 3  ;;  %v2532_v53 = vpop.f32.mrb[7].mxu0 }
 0x16d   : > { %v585_v54 = vpack.c.bf16 %v2532_v53, %v2519_v43  ;;  %v596_v55 = vrot.slane %v2532_v53, 1  ;;  %v639_v56 = vrot.slane %v2532_v53, 2  ;;  %v680_v57 = vrot.slane %v2532_v53, 3 }
 0x16e   : > { %772 = vrot.lane.b32.xlu0 %v708_v40, %s2288_s10  ;;  %v621_v58 = vsel %vm609_vm9, %v594_v18, %v595_v45  ;;  %v662_v59 = vsel %vm650_vm8, %v637_v19, %v638_v46  ;;  %v703_v60 = vsel %vm691_vm10, %v678_v20, %v679_v47  ;;  %v2548_v61 = vsel %vm609_vm9, %v597_v41, %v598_v50 }
 0x16f   : > { %v627_v62 = vpack.c.bf16 %v621_v58, %v622_v28  ;;  %v668_v63 = vpack.c.bf16 %v662_v59, %v663_v29  ;;  %v709_v0 = vpack.c.bf16 %v703_v60, %v2493_v30  ;;  %v619_v1 = vsel %vm609_vm9, %v596_v55, %v597_v41 }
 0x170   : > { %v620_v3 = vsel %vm609_vm9, %v595_v45, %v596_v55  ;;  %v660_v6 = vsel %vm650_vm8, %v639_v56, %v640_v42  ;;  %v661_v9 = vsel %vm650_vm8, %v638_v46, %v639_v56  ;;  %v701_v12 = vsel %vm691_vm10, %v680_v57, %v681_v44 }
 0x171   : > { %726 = vrot.lane.b32.xlu1 %v627_v62, %s2287_s9  ;;  %v2562_v13 = vpop.f32.mrb[8].mxu0  ;;  %v628_v18 = vpack.c.bf16 %v619_v1, %v620_v3  ;;  %v669_v19 = vpack.c.bf16 %v660_v6, %v661_v9  ;;  %v702_v20 = vsel %vm691_vm10, %v679_v47, %v680_v57  ;;  %v659_v22 = vsel %vm650_vm8, %v640_v42, %v641_v51 }
 0x172   : > { %v601_v24 = vrot.slane %v2562_v13, 1  ;;  %v644_v25 = vrot.slane %v2562_v13, 2  ;;  %v685_v26 = vrot.slane %v2562_v13, 3  ;;  %750 = vrot.lane.b32.xlu0 %v668_v63, %s2286_s8  ;;  %v2572_v28 = vpop.f32.mrb[9].mxu0  ;;  %v710_v29 = vpack.c.bf16 %v701_v12, %v702_v20 }
 0x173   : > { %v599_v30 = vrot.slane %v2572_v28, 1  ;;  %v642_v31 = vrot.slane %v2572_v28, 2  ;;  %v683_v32 = vrot.slane %v2572_v28, 3  ;;  %v2577_v33 = vpop.f32.mrb[10].mxu0  ;;  %v2581_v34 = vsel %vm691_vm10, %v681_v44, %v682_v52 }
 0x174   : > { %v588_v35 = vpack.c.bf16 %v2577_v33, %v2562_v13  ;;  %v602_v36 = vrot.slane %v2577_v33, 1  ;;  %v645_v37 = vrot.slane %v2577_v33, 2  ;;  %v686_v38 = vrot.slane %v2577_v33, 3  ;;  %v2588_v40 = vpop.f32.mrb[11].mxu0 }
 0x175   : > { %774 = vrot.lane.b32.xlu1 %v709_v0, %s2288_s10  ;;  %v587_v41 = vpack.c.bf16 %v2588_v40, %v2572_v28  ;;  %v600_v42 = vrot.slane %v2588_v40, 1  ;;  %v643_v44 = vrot.slane %v2588_v40, 2  ;;  %v684_v45 = vrot.slane %v2588_v40, 3 }
 0x176   : > { %728 = vrot.lane.b32.xlu0 %v628_v18, %s2287_s9  ;;  %v617_v46 = vsel %vm609_vm9, %v598_v50, %v599_v30  ;;  %v658_v47 = vsel %vm650_vm8, %v641_v51, %v642_v31  ;;  %v699_v55 = vsel %vm691_vm10, %v682_v52, %v683_v32  ;;  %v2605_v56 = vsel %vm609_vm9, %v601_v24, %v602_v36 }
 0x177   : > { %v629_v57 = vpack.c.bf16 %v617_v46, %v2548_v61  ;;  %v670_v58 = vpack.c.bf16 %v658_v47, %v659_v22  ;;  %v711_v59 = vpack.c.bf16 %v699_v55, %v2581_v34  ;;  %v615_v60 = vsel %vm609_vm9, %v600_v42, %v601_v24 }
 0x178   : > { %v616_v50 = vsel %vm609_vm9, %v599_v30, %v600_v42  ;;  %v656_v51 = vsel %vm650_vm8, %v643_v44, %v644_v25  ;;  %v657_v52 = vsel %vm650_vm8, %v642_v31, %v643_v44  ;;  %v697_v62 = vsel %vm691_vm10, %v684_v45, %v685_v26 }
 0x179   : > { %752 = vrot.lane.b32.xlu1 %v669_v19, %s2286_s8  ;;  %v2620_v61 = vpop.f32.mrb[12].mxu0  ;;  %v630_v63 = vpack.c.bf16 %v615_v60, %v616_v50  ;;  %v671_v0 = vpack.c.bf16 %v656_v51, %v657_v52  ;;  %v698_v1 = vsel %vm691_vm10, %v683_v32, %v684_v45  ;;  %v655_v3 = vsel %vm650_vm8, %v644_v25, %v645_v37 }
 0x17a   : > { %v605_v6 = vrot.slane %v2620_v61, 1  ;;  %v648_v9 = vrot.slane %v2620_v61, 2  ;;  %v689_v12 = vrot.slane %v2620_v61, 3  ;;  %776 = vrot.lane.b32.xlu0 %v710_v29, %s2288_s10  ;;  %v2630_v18 = vpop.f32.mrb[13].mxu0  ;;  %v712_v19 = vpack.c.bf16 %v697_v62, %v698_v1 }
 0x17b   : > { %v603_v20 = vrot.slane %v2630_v18, 1  ;;  %v646_v22 = vrot.slane %v2630_v18, 2  ;;  %v687_v24 = vrot.slane %v2630_v18, 3  ;;  %v2635_v30 = vpop.f32.mrb[14].mxu0  ;;  %v696_v25 = vsel %vm691_vm10, %v685_v26, %v686_v38 }
 0x17c   : > { %v590_v31 = vpack.c.bf16 %v2635_v30, %v2620_v61  ;;  %v606_v32 = vrot.slane %v2635_v30, 1  ;;  %v649_v29 = vrot.slane %v2635_v30, 2  ;;  %v690_v34 = vrot.slane %v2635_v30, 3  ;;  %v2644_v42 = vpop.f32.mrb[15].mxu0  ;;  %v2252_v61 = vld [vmem:[%s3110_s5 + $0x80] sm:$0xff]  }
 0x17d   : > { %730 = vrot.lane.b32.xlu1 %v629_v57, %s2287_s9  ;;  %v613_v44 = vsel %vm609_vm9, %v602_v36, %v603_v20  ;;  %v589_v45 = vpack.c.bf16 %v2644_v42, %v2630_v18  ;;  %v604_v26 = vrot.slane %v2644_v42, 1  ;;  %v647_v46 = vrot.slane %v2644_v42, 2 }
 0x17e   : > { %754 = vrot.lane.b32.xlu0 %v670_v58, %s2286_s8  ;;  %v631_v47 = vpack.c.bf16 %v613_v44, %v2605_v56  ;;  %v688_v55 = vrot.slane %v2644_v42, 3  ;;  %v654_v60 = vsel %vm650_vm8, %v645_v37, %v646_v22  ;;  %v695_v57 = vsel %vm691_vm10, %v686_v38, %v687_v24 }
 0x17f   : > { %v672_v36 = vpack.c.bf16 %v654_v60, %v655_v3  ;;  %v713_v50 = vpack.c.bf16 %v695_v57, %v696_v25  ;;  %v611_v51 = vsel %vm609_vm9, %v604_v26, %v605_v6  ;;  %v612_v52 = vsel %vm609_vm9, %v603_v20, %v604_v26 }
 0x180   : > { %v632_v62 = vpack.c.bf16 %v611_v51, %v612_v52  ;;  %v652_v56 = vsel %vm650_vm8, %v647_v46, %v648_v9  ;;  %v653_v58 = vsel %vm650_vm8, %v646_v22, %v647_v46  ;;  %v693_v37 = vsel %vm691_vm10, %v688_v55, %v689_v12 }
 0x181   : > { %778 = vrot.lane.b32.xlu1 %v711_v59, %s2288_s10  ;;  %v673_v38 = vpack.c.bf16 %v652_v56, %v653_v58  ;;  %v694_v1 = vsel %vm691_vm10, %v687_v24, %v688_v55  ;;  %v610_v3 = vsel %vm609_vm9, %v605_v6, %v606_v32  ;;  %v625_v20 = vsel %vm609_vm9, %v606_v32, %v591_v14 }
 0x182   : > { %732 = vrot.lane.b32.xlu0 %v630_v63, %s2287_s9  ;;  %v714_v22 = vpack.c.bf16 %v693_v37, %v694_v1  ;;  %v633_v25 = vpack.c.bf16 %v625_v20, %v610_v3  ;;  %v651_v44 = vsel %vm650_vm8, %v648_v9, %v649_v29  ;;  %v666_v59 = vsel %vm650_vm8, %v649_v29, %v634_v15 }
 0x183   : > { %v674_v24 = vpack.c.bf16 %v666_v59, %v651_v44  ;;  %v692_v6 = vsel %vm691_vm10, %v689_v12, %v690_v34  ;;  %v707_v14 = vsel %vm691_vm10, %v690_v34, %v675_v27  ;;  %v2289_v30 = vmov 0.0   ;;  %v2257_v44 = vld [vmem:[%s3110_s5] sm:$0xff]  }
 0x184   : > { %v715_v63 = vpack.c.bf16 %v707_v14, %v692_v6  ;;  %2177 = vmatprep.subr.bf16.mxu1 %v2289_v30  ;;  %v2259_v59 = vld [vmem:[%s3110_s5 + $0xa0] sm:$0xff]   ;;  %v2260_v6 = vld [vmem:[%s3110_s5 + $0x8] sm:$0xff]  }
 0x185   : > { %756 = vrot.lane.b32.xlu1 %v671_v0, %s2286_s8  ;;  %v2262_v14 = vld [vmem:[%s3110_s5 + $0xa8] sm:$0xff]  }
 0x186   : > { %780 = vrot.lane.b32.xlu0 %v712_v19, %s2288_s10 }
 0x189   : > { %734 = vrot.lane.b32.xlu1 %v631_v47, %s2287_s9 }
 0x18a   : > { %758 = vrot.lane.b32.xlu0 %v672_v36, %s2286_s8 }
 0x18d   : > { %782 = vrot.lane.b32.xlu1 %v713_v50, %s2288_s10 }
 0x18e   : > { %736 = vrot.lane.b32.xlu0 %v632_v62, %s2287_s9 }
 0x191   : > { %760 = vrot.lane.b32.xlu1 %v673_v38, %s2286_s8 }
 0x192   : > { %784 = vrot.lane.b32.xlu0 %v714_v22, %s2288_s10  ;;  %v2254_v22 = vld [vmem:[%s3110_s5 + $0x90] sm:$0xff]  }
 0x195   : > { %738 = vrot.lane.b32.xlu1 %v633_v25, %s2287_s9  ;;  %v2256_v25 = vld [vmem:[%s3110_s5 + $0x40] sm:$0xff]  }
 0x196   : > { %762 = vrot.lane.b32.xlu0 %v674_v24, %s2286_s8  ;;  %2082 = vmatprep.subr.bf16.mxu0 %v2256_v25  ;;  %v2258_v24 = vld [vmem:[%s3110_s5 + $0x48] sm:$0xff]  }
 0x199   : > { %786 = vrot.lane.b32.xlu1 %v715_v63, %s2288_s10  ;;  %v2261_v63 = vld [vmem:[%s3110_s5 + $0x50] sm:$0xff]  }
 0x1dc   : > { %v725_v15 = vpop.permute.xlu0 %724  ;;  %v749_v27 = vpop.permute.xlu1 %748 }
 0x1dd   : > { %v791_v0 = vsel %vm788_vm11, %v583_v23, %v725_v15  ;;  %v2263_v15 = vld [vmem:[%s3110_s5 + $0x10] sm:$0xff]  }
 0x1de   : > { %v815_v12 = vsel %vm813_vm12, %v791_v0, %v749_v27  ;;  %v2265_v27 = vld [vmem:[%s3110_s5 + $0xb0] sm:$0xff]   ;;  %v2264_v0 = vld [vmem:[%s3110_s5 + $0x58] sm:$0xff]  }
 0x1e0   : > { %v773_v9 = vpop.permute.xlu0 %772 }
 0x1e1   : > { %v832_v19 = vsel %vm830_vm13, %v815_v12, %v773_v9  ;;  %v2266_v9 = vld [vmem:[%s3110_s5 + $0x18] sm:$0xff]  }
 0x1e2   : > { %1065 = vmatmul.mubr.bf16.vlgmr.msra.gmra.mrb[0].mxu1 %v832_v19  ;;  %2161 = vmatprep.mubr.bf16.mxu0 %v832_v19  ;;  %v2268_v12 = vld [vmem:[%s3110_s5 + $0xb8] sm:$0xff]   ;;  %v2267_v19 = vld [vmem:[%s3110_s5 + $0x60] sm:$0xff]  }
 0x1e3   : > { %v727_v32 = vpop.permute.xlu1 %726  ;;  %1074 = vmatprep.mubr.bf16.mxu1 %v2285_v8  ;;  %2178 = vmatpush3.bf16.msra.mxu1 %v2252_v61 }
 0x1e4   : > { %v794_v29 = vsel %vm788_vm11, %v584_v17, %v727_v32  ;;  %v751_v10 = vpop.permute.xlu0 %750  ;;  %2179 = vmatprep.subr.bf16.mxu1 %v2289_v30  ;;  %v2269_v32 = vld [vmem:[%s3110_s5 + $0x20] sm:$0xff]  }
 0x1e5   : > { %v817_v21 = vsel %vm813_vm12, %v794_v29, %v751_v10  ;;  %v2270_v29 = vld [vmem:[%s3110_s5 + $0x68] sm:$0xff]  }
 0x1e6   : > { %v2271_v10 = vld [vmem:[%s3110_s5 + $0x28] sm:$0xff]  }
 0x1e7   : > { %v775_v23 = vpop.permute.xlu1 %774 }
 0x1e8   : > { %v835_v34 = vsel %vm830_vm13, %v817_v21, %v775_v23  ;;  %v729_v26 = vpop.permute.xlu0 %728  ;;  %v2272_v21 = vld [vmem:[%s3110_s5 + $0x70] sm:$0xff]  }
 0x1e9   : > { %2162 = vmatmul.mubr.bf16.vlgmr.msra.gmra.mrb[16].mxu0 %v835_v34  ;;  %v797_v46 = vsel %vm788_vm11, %v585_v54, %v729_v26  ;;  %v2273_v23 = vld [vmem:[%s3110_s5 + $0x30] sm:$0xff]   ;;  %v2275_v26 = vld [vmem:[%s3110_s5 + $0x38] sm:$0xff]  }
 0x1ea   : > { %1075 = vmatmul.mubr.bf16.gmra.mrb[4].mxu1 %v835_v34  ;;  %2083 = vmatpush3.bf16.msra.mxu0 %v2257_v44  ;;  %v2274_v34 = vld [vmem:[%s3110_s5 + $0x78] sm:$0xff]  }
 0x1eb   : > { %v753_v47 = vpop.permute.xlu1 %752  ;;  %1084 = vmatprep.mubr.bf16.mxu1 %v2285_v8  ;;  %2084 = vmatprep.subr.bf16.mxu0 %v2258_v24 }
 0x1ec   : > { %v819_v7 = vsel %vm813_vm12, %v797_v46, %v753_v47  ;;  %v777_v16 = vpop.permute.xlu0 %776  ;;  %v887_v46 = vld [vmem:[%s3108_s3] sm:$0x7] }
 0x1ed   : > { %v838_v17 = vsel %vm830_vm13, %v819_v7, %v777_v16  ;;  %v2835_v47 = vrot.slane %v887_v46, %v280_v5  ;;  %v2839_v7 = vrot.slane %v887_v46, %v291_v4  ;;  %v2851_v4 = vld [vmem:[%s3109_s4] sm:$0xff] }
 0x1ee   : > { %2165 = vmatprep.mubr.bf16.mxu0 %v838_v17  ;;  %2085 = vmatpush3.bf16.msra.mxu0 %v2260_v6 }
 0x1ef   : > { %v731_v55 = vpop.permute.xlu1 %730  ;;  %2086 = vmatprep.subr.bf16.mxu0 %v2261_v63 }
 0x1f0   : > { %v800_v60 = vsel %vm788_vm11, %v586_v49, %v731_v55  ;;  %v755_v57 = vpop.permute.xlu0 %754 }
 0x1f1   : > { %v821_v43 = vsel %vm813_vm12, %v800_v60, %v755_v57 }
 0x1f2   : > { %1085 = vmatmul.mubr.bf16.gmra.mrb[8].mxu1 %v838_v17  ;;  %2087 = vmatpush3.bf16.msra.mxu0 %v2263_v15 }
 0x1f3   : > { %v779_v53 = vpop.permute.xlu1 %778  ;;  %1094 = vmatprep.mubr.bf16.mxu1 %v2285_v8  ;;  %2088 = vmatprep.subr.bf16.mxu0 %v2264_v0 }
 0x1f4   : > { %v841_v54 = vsel %vm830_vm13, %v821_v43, %v779_v53  ;;  %v733_v36 = vpop.permute.xlu0 %732 }
 0x1f5   : > { %2166 = vmatmul.mubr.bf16.gmra.mrb[20].mxu0 %v841_v54  ;;  %v803_v50 = vsel %vm788_vm11, %v587_v41, %v733_v36  ;;  %v2846_v36 = vrot.slane %v887_v46, %v302_v11  ;;  %v2867_v11 = vld [vmem:[%s3109_s4 + $0x20] sm:$0xff] }
 0x1f6   : > { %2089 = vmatpush3.bf16.msra.mxu0 %v2266_v9 }
 0x1f7   : > { %v757_v51 = vpop.permute.xlu1 %756  ;;  %2090 = vmatprep.subr.bf16.mxu0 %v2267_v19 }
 0x1f8   : > { %v823_v39 = vsel %vm813_vm12, %v803_v50, %v757_v51  ;;  %v781_v48 = vpop.permute.xlu0 %780  ;;  %v2856_v50 = vld [vmem:[%s3109_s4 + $0x18] sm:$0xff] }
 0x1f9   : > { %v844_v49 = vsel %vm830_vm13, %v823_v39, %v781_v48  ;;  %v2862_v39 = vld [vmem:[%s3109_s4 + $0x8] sm:$0xff] }
 0x1fa   : > { %1095 = vmatmul.mubr.bf16.gmra.mrb[12].mxu1 %v841_v54  ;;  %2169 = vmatprep.mubr.bf16.mxu0 %v844_v49 }
 0x1fb   : > { %v735_v52 = vpop.permute.xlu1 %734  ;;  %1104 = vmatprep.mubr.bf16.mxu1 %v2285_v8  ;;  %2091 = vmatpush3.bf16.msra.mxu0 %v2269_v32 }
 0x1fc   : > { %v806_v62 = vsel %vm788_vm11, %v588_v35, %v735_v52  ;;  %v759_v56 = vpop.permute.xlu0 %758  ;;  %2092 = vmatprep.subr.bf16.mxu0 %v2270_v29 }
 0x1fd   : > { %v825_v28 = vsel %vm813_vm12, %v806_v62, %v759_v56 }
 0x1ff   : > { %v783_v40 = vpop.permute.xlu1 %782  ;;  %2093 = vmatpush3.bf16.msra.mxu0 %v2271_v10 }
 0x200   : > { %v847_v41 = vsel %vm830_vm13, %v825_v28, %v783_v40  ;;  %v737_v58 = vpop.permute.xlu0 %736  ;;  %2094 = vmatprep.subr.bf16.mxu0 %v2272_v21 }
 0x201   : > { %2170 = vmatmul.mubr.bf16.gmra.mrb[24].mxu0 %v847_v41  ;;  %v809_v37 = vsel %vm788_vm11, %v589_v45, %v737_v58 }
 0x202   : > { %1105 = vmatmul.mubr.bf16.gmra.mrb[16].mxu1 %v844_v49 }
 0x203   : > { %v761_v38 = vpop.permute.xlu1 %760  ;;  %1114 = vmatprep.mubr.bf16.mxu1 %v2285_v8  ;;  %2095 = vmatpush3.bf16.msra.mxu0 %v2273_v23 }
 0x204   : > { %v827_v13 = vsel %vm813_vm12, %v809_v37, %v761_v38  ;;  %v785_v33 = vpop.permute.xlu0 %784  ;;  %2096 = vmatprep.subr.bf16.mxu0 %v2274_v34 }
 0x205   : > { %v850_v35 = vsel %vm830_vm13, %v827_v13, %v785_v33 }
 0x206   : > { %2173 = vmatprep.mubr.bf16.mxu0 %v850_v35 }
 0x207   : > { %v739_v1 = vpop.permute.xlu1 %738  ;;  %2097 = vmatpush3.bf16.msra.mxu0 %v2275_v26 }
 0x208   : > { %v812_v3 = vsel %vm788_vm11, %v590_v31, %v739_v1  ;;  %v763_v20 = vpop.permute.xlu0 %762  ;;  %v2253_v31 = vld [vmem:[%s3110_s5 + $0x88] sm:$0xff]  }
 0x209   : > { %v829_v18 = vsel %vm813_vm12, %v812_v3, %v763_v20  ;;  %2180 = vmatpush3.bf16.msra.mxu1 %v2253_v31  ;;  %v2879_v20 = vld [vmem:[%s3109_s4 + $0x10] sm:$0xff] }
 0x20a   : > { %1115 = vmatmul.mubr.bf16.gmra.mrb[20].mxu1 %v847_v41  ;;  %2181 = vmatprep.subr.bf16.mxu1 %v2289_v30 }
 0x20b   : > { %v787_v42 = vpop.permute.xlu1 %786  ;;  %1124 = vmatprep.mubr.bf16.mxu1 %v2285_v8 }
 0x20c   : > { %v853_v45 = vsel %vm830_vm13, %v829_v18, %v787_v42 }
 0x20d   : > { %2174 = vmatmul.mubr.bf16.gmra.mrb[28].mxu0 %v853_v45  ;;  %2182 = vmatpush3.bf16.msra.mxu1 %v2254_v22 }
 0x20e   : > { %2183 = vmatprep.subr.bf16.mxu1 %v2289_v30 }
 0x212   : > { %1125 = vmatmul.mubr.bf16.gmra.mrb[24].mxu1 %v850_v35 }
 0x213   : > { %1134 = vmatprep.mubr.bf16.mxu1 %v2285_v8  ;;  %v2255_v8 = vld [vmem:[%s3110_s5 + $0x98] sm:$0xff]  }
 0x214   : > { %2184 = vmatpush3.bf16.msra.mxu1 %v2255_v8  ;;  %v2886_v8 = vld [vmem:[%s3109_s4 + $0x28] sm:$0xff] }
 0x215   : > { %2185 = vmatprep.subr.bf16.mxu1 %v2289_v30 }
 0x218   : > { %2186 = vmatpush3.bf16.msra.mxu1 %v2259_v59 }
 0x219   : > { %2187 = vmatprep.subr.bf16.mxu1 %v2289_v30 }
 0x21a   : > { %1135 = vmatmul.mubr.bf16.gmra.mrb[28].mxu1 %v853_v45 }
 0x21b   : > { %2193 = vmatprep.mubr.msk.bf16.mxu1 %vm2290_vm14, %v2289_v30 }
 0x21c   : > { %2188 = vmatpush3.bf16.msra.mxu1 %v2262_v14 }
 0x21d   : > { %2189 = vmatprep.subr.bf16.mxu1 %v2289_v30 }
 0x220   : > { %2190 = vmatpush3.bf16.msra.mxu1 %v2265_v27 }
 0x221   : > { %2191 = vmatprep.subr.bf16.mxu1 %v2289_v30 }
 0x224   : > { %2192 = vmatpush3.bf16.msra.mxu1 %v2268_v12 }
 0x2b5   : > { %v1066_v16 = vpop.f32.mrb[0].mxu1 }
 0x2b6   : > { %v1067_v17 = vadd.f32 %v1066_v16, %v2835_v47  ;;  %v1068_v55 = vpop.f32.mrb[1].mxu1 }
 0x2b7   : > { %v1069_v60 = vadd.f32 %v1068_v55, %v2839_v7  ;;  %v1070_v57 = vpop.f32.mrb[2].mxu1 }
 0x2b8   : > { %v1242_v43 = vmax.f32 %v1067_v17, 0.0  ;;  %v1071_v53 = vadd.f32 %v1070_v57, %v2835_v47  ;;  %v1072_v54 = vpop.f32.mrb[3].mxu1 }
 0x2b9   : > { %v1243_v5 = vmax.f32 %v1069_v60, 0.0  ;;  %v1073_v51 = vadd.f32 %v1072_v54, %v2839_v7 }
 0x2ba   : > { %v1245_v2 = vmax.f32 %v1071_v53, 0.0  ;;  %v1296_v49 = vmul.f32 %v2851_v4, %v1242_v43 }
 0x2bb   : > { %v1246_v48 = vmax.f32 %v1073_v51, 0.0  ;;  %v1297_v56 = vmul.f32 %v2862_v39, %v1243_v5 }
 0x2bc   : > { %v1299_v52 = vmul.f32 %v2856_v50, %v1245_v2  ;;  %v2163_v62 = vpop.f32.mrb[16].mxu0 }
 0x2bd   : > { %v1300_v28 = vmul.f32 %v2867_v11, %v1246_v48  ;;  %v1188_v40 = vadd.f32 %v2163_v62, %v2846_v36  ;;  %v1179_v41 = vpop.f32.mrb[17].mxu0  ;;  %v1076_v58 = vpop.f32.mrb[4].mxu1 }
 0x2be   : > { %v1344_v37 = vmax.f32 %v1296_v49, %v1299_v52  ;;  %v1180_v38 = vadd.f32 %v1179_v41, %v2846_v36  ;;  %v1077_v13 = vadd.f32 %v1076_v58, %v2835_v47  ;;  %v2164_v33 = vpop.f32.mrb[18].mxu0  ;;  %v1078_v35 = vpop.f32.mrb[5].mxu1 }
 0x2bf   : > { %v1351_v1 = vmax.f32 %v1297_v56, %v1300_v28  ;;  %v1250_v3 = vmax.f32 %v1188_v40, 0.0  ;;  %v1191_v18 = vadd.f32 %v2164_v33, %v2846_v36  ;;  %v1079_v42 = vadd.f32 %v1078_v35, %v2839_v7  ;;  %v1182_v45 = vpop.f32.mrb[19].mxu0  ;;  %v1080_v61 = vpop.f32.mrb[6].mxu1 }
 0x2c0   : > { %v1345_v30 = vrot.slane %v1344_v37, 4  ;;  %v1244_v31 = vmax.f32 %v1180_v38, 0.0  ;;  %v1248_v22 = vmax.f32 %v1077_v13, 0.0  ;;  %v1183_v25 = vadd.f32 %v1182_v45, %v2846_v36  ;;  %v1082_v44 = vpop.f32.mrb[7].mxu1 }
 0x2c1   : > { %v1352_v59 = vrot.slane %v1351_v1, 4  ;;  %v1253_v24 = vmax.f32 %v1191_v18, 0.0  ;;  %v1249_v6 = vmax.f32 %v1079_v42, 0.0  ;;  %v1304_v63 = vmul.f32 %v2879_v20, %v1250_v3 }
 0x2c2   : > { %v1346_v14 = vmax.f32 %v1344_v37, %v1345_v30  ;;  %v1247_v15 = vmax.f32 %v1183_v25, 0.0  ;;  %v1298_v0 = vmul.f32 %v2879_v20, %v1244_v31  ;;  %v1081_v12 = vadd.f32 %v1080_v61, %v2835_v47 }
 0x2c3   : > { %v1353_v27 = vmax.f32 %v1351_v1, %v1352_v59  ;;  %v1307_v9 = vmul.f32 %v2886_v8, %v1253_v24  ;;  %v1302_v32 = vmul.f32 %v2851_v4, %v1248_v22  ;;  %v1083_v10 = vadd.f32 %v1082_v44, %v2839_v7 }
 0x2c4   : > { %v1347_v19 = vrot.slane %v1346_v14, 2  ;;  %v1301_v29 = vmul.f32 %v2886_v8, %v1247_v15  ;;  %v1303_v34 = vmul.f32 %v2862_v39, %v1249_v6  ;;  %v1251_v26 = vmax.f32 %v1081_v12, 0.0 }
 0x2c5   : > { %v1354_v21 = vrot.slane %v1353_v27, 2  ;;  %v1379_v23 = vmax.f32 %v1304_v63, %v1307_v9  ;;  %v1086_v46 = vpop.f32.mrb[8].mxu1  ;;  %v1252_v55 = vmax.f32 %v1083_v10, 0.0 }
 0x2c6   : > { %v1348_v16 = vmax.f32 %v1346_v14, %v1347_v19  ;;  %v1358_v17 = vmax.f32 %v1298_v0, %v1301_v29  ;;  %v1087_v60 = vadd.f32 %v1086_v46, %v2835_v47  ;;  %v1088_v57 = vpop.f32.mrb[9].mxu1  ;;  %v1305_v54 = vmul.f32 %v2856_v50, %v1251_v26 }
 0x2c7   : > { %v1355_v43 = vmax.f32 %v1353_v27, %v1354_v21  ;;  %v1380_v53 = vrot.slane %v1379_v23, 4  ;;  %v1089_v5 = vadd.f32 %v1088_v57, %v2839_v7  ;;  %v1090_v51 = vpop.f32.mrb[10].mxu1  ;;  %v1306_v49 = vmul.f32 %v2867_v11, %v1252_v55 }
 0x2c8   : > { %v1349_v2 = vrot.slane %v1348_v16, 1  ;;  %v1359_v48 = vrot.slane %v1358_v17, 4  ;;  %v1254_v52 = vmax.f32 %v1087_v60, 0.0  ;;  %v2167_v62 = vpop.f32.mrb[20].mxu0  ;;  %v1092_v56 = vpop.f32.mrb[11].mxu1  ;;  %v1365_v41 = vmax.f32 %v1302_v32, %v1305_v54 }
 0x2c9   : > { %v1356_v28 = vrot.slane %v1355_v43, 1  ;;  %v1381_v40 = vmax.f32 %v1379_v23, %v1380_v53  ;;  %v1255_v58 = vmax.f32 %v1089_v5, 0.0  ;;  %v1195_v37 = vpop.f32.mrb[21].mxu0  ;;  %v1372_v33 = vmax.f32 %v1303_v34, %v1306_v49 }
 0x2ca   : > { %v1350_v38 = vmax.f32 %v1348_v16, %v1349_v2  ;;  %v1360_v13 = vmax.f32 %v1358_v17, %v1359_v48  ;;  %v1308_v35 = vmul.f32 %v2851_v4, %v1254_v52  ;;  %v2168_v1 = vpop.f32.mrb[22].mxu0  ;;  %v1366_v42 = vrot.slane %v1365_v41, 4 }
 0x2cb   : > { %v1357_v3 = vmax.f32 %v1355_v43, %v1356_v28  ;;  %v1382_v18 = vrot.slane %v1381_v40, 2  ;;  %v1309_v45 = vmul.f32 %v2862_v39, %v1255_v58  ;;  %v1198_v61 = vpop.f32.mrb[23].mxu0  ;;  %v1373_v22 = vrot.slane %v1372_v33, 4 }
 0x2cc   : > { %v1512_v30 = vpack.c.bf16 %v1350_v38, %v1350_v38  ;;  %v1361_v31 = vrot.slane %v1360_v13, 2  ;;  %v1091_v25 = vadd.f32 %v1090_v51, %v2835_v47  ;;  %v1367_v24 = vmax.f32 %v1365_v41, %v1366_v42 }
 0x2cd   : > { %v1513_v44 = vpack.c.bf16 %v1357_v3, %v1357_v3  ;;  %v1383_v59 = vmax.f32 %v1381_v40, %v1382_v18  ;;  %v1204_v6 = vadd.f32 %v2167_v62, %v2846_v36  ;;  %v1096_v14 = vpop.f32.mrb[12].mxu1  ;;  %v1374_v27 = vmax.f32 %v1372_v33, %v1373_v22 }
 0x2ce   : > { %v2905_v63 = vunpack.c.l.b16 %v1512_v30  ;;  %v1362_v15 = vmax.f32 %v1360_v13, %v1361_v31  ;;  %v1257_v0 = vmax.f32 %v1091_v25, 0.0  ;;  %v1098_v9 = vpop.f32.mrb[13].mxu1  ;;  %v1368_v32 = vrot.slane %v1367_v24, 2 }
 0x2cf   : > { %v2907_v12 = vunpack.c.l.b16 %v1513_v44  ;;  %v1384_v19 = vrot.slane %v1383_v59, 1  ;;  %v1262_v29 = vmax.f32 %v1204_v6, 0.0  ;;  %v2909_v10 = vpop.f32.mrb[14].mxu1  ;;  %v1375_v23 = vrot.slane %v1374_v27, 2 }
 0x2d0   : > { %v1363_v21 = vrot.slane %v1362_v15, 1  ;;  %v1311_v34 = vmul.f32 %v2856_v50, %v1257_v0  ;;  %v1093_v26 = vadd.f32 %v1092_v56, %v2839_v7  ;;  %v1102_v46 = vpop.f32.mrb[15].mxu1  ;;  %v1369_v17 = vmax.f32 %v1367_v24, %v1368_v32 }
 0x2d1   : > { %v1385_v16 = vmax.f32 %v1383_v59, %v1384_v19  ;;  %v1316_v55 = vmul.f32 %v2879_v20, %v1262_v29  ;;  %v1196_v60 = vadd.f32 %v1195_v37, %v2846_v36  ;;  %v1376_v43 = vmax.f32 %v1374_v27, %v1375_v23 }
 0x2d2   : > { %v1364_v57 = vmax.f32 %v1362_v15, %v1363_v21  ;;  %v1386_v53 = vmax.f32 %v1308_v35, %v1311_v34  ;;  %v1258_v54 = vmax.f32 %v1093_v26, 0.0  ;;  %v1370_v51 = vrot.slane %v1369_v17, 1 }
 0x2d3   : > { %v1517_v5 = vpack.c.bf16 %v1385_v16, %v1385_v16  ;;  %v1256_v2 = vmax.f32 %v1196_v60, 0.0  ;;  %v1207_v48 = vadd.f32 %v2168_v1, %v2846_v36  ;;  %v1377_v52 = vrot.slane %v1376_v43, 1 }
 0x2d4   : > { %v1514_v49 = vpack.c.bf16 %v1364_v57, %v1364_v57  ;;  %v1387_v62 = vrot.slane %v1386_v53, 4  ;;  %v1312_v56 = vmul.f32 %v2867_v11, %v1258_v54  ;;  %v2171_v28 = vpop.f32.mrb[24].mxu0  ;;  %v1371_v41 = vmax.f32 %v1369_v17, %v1370_v51 }
 0x2d5   : > { %v1620_v40 = vunpack.c.l.b16 %v1517_v5  ;;  %v1310_v58 = vmul.f32 %v2879_v20, %v1256_v2  ;;  %v1265_v37 = vmax.f32 %v1207_v48, 0.0  ;;  %v1211_v38 = vpop.f32.mrb[25].mxu0  ;;  %v2918_v13 = vpop.f32.mrb[16].mxu1  ;;  %v1378_v35 = vmax.f32 %v1376_v43, %v1377_v52 }
 0x2d6   : > { %v1617_v33 = vunpack.c.l.b16 %v1514_v49  ;;  %v1388_v3 = vmax.f32 %v1386_v53, %v1387_v62  ;;  %v1393_v18 = vmax.f32 %v1309_v45, %v1312_v56  ;;  %v2920_v42 = vpop.f32.mrb[26].mxu0  ;;  %v2922_v1 = vpop.f32.mrb[17].mxu1  ;;  %v1515_v30 = vpack.c.bf16 %v1371_v41, %v1371_v41 }
 0x2d7   : > { %v1319_v31 = vmul.f32 %v2886_v8, %v1265_v37  ;;  %v1199_v22 = vadd.f32 %v1198_v61, %v2846_v36  ;;  %v1097_v25 = vadd.f32 %v1096_v14, %v2835_v47  ;;  %v2927_v44 = vpop.f32.mrb[27].mxu0  ;;  %v2929_v59 = vpop.f32.mrb[18].mxu1  ;;  %v1516_v6 = vpack.c.bf16 %v1378_v35, %v1378_v35 }
 0x2d8   : > { %v2932_v24 = vsel %vm1639_vm15, %v1620_v40, %v1617_v33  ;;  %v1389_v45 = vrot.slane %v1388_v3, 2  ;;  %v1394_v15 = vrot.slane %v1393_v18, 4  ;;  %v2934_v27 = vpop.f32.mrb[19].mxu1  ;;  %v1618_v0 = vunpack.c.l.b16 %v1515_v30 }
 0x2d9   : > { %v1421_v19 = vmax.f32 %v1316_v55, %v1319_v31  ;;  %v1259_v32 = vmax.f32 %v1199_v22, 0.0  ;;  %v1260_v29 = vmax.f32 %v1097_v25, 0.0  ;;  %v1619_v61 = vunpack.c.l.b16 %v1516_v6 }
 0x2da   : > { %v1390_v21 = vmax.f32 %v1388_v3, %v1389_v45  ;;  %v1395_v14 = vmax.f32 %v1393_v18, %v1394_v15  ;;  %v1099_v23 = vadd.f32 %v1098_v9, %v2839_v7  ;;  %v1640_v34 = vsel %vm1639_vm15, %v1618_v0, %v2905_v63 }
 0x2db   : > { %v1422_v26 = vrot.slane %v1421_v19, 4  ;;  %v1313_v16 = vmul.f32 %v2886_v8, %v1259_v32  ;;  %v1314_v17 = vmul.f32 %v2851_v4, %v1260_v29  ;;  %v2943_v60 = vsel %vm1639_vm15, %v1619_v61, %v2907_v12 }
 0x2dc   : > { %v1391_v55 = vrot.slane %v1390_v21, 1  ;;  %v1396_v57 = vrot.slane %v1395_v14, 2  ;;  %v1261_v43 = vmax.f32 %v1099_v23, 0.0  ;;  %v1101_v9 = vadd.f32 %v2909_v10, %v2835_v47 }
 0x2dd   : > { %v1423_v53 = vmax.f32 %v1421_v19, %v1422_v26  ;;  %v1400_v54 = vmax.f32 %v1310_v58, %v1313_v16  ;;  %v1103_v5 = vadd.f32 %v1102_v46, %v2839_v7  ;;  %v2948_v63 = vpop.f32.mrb[20].mxu1  ;;  %v1220_v49 = vadd.f32 %v2171_v28, %v2846_v36 }
 0x2de   : > { %v1392_v51 = vmax.f32 %v1390_v21, %v1391_v55  ;;  %v1397_v2 = vmax.f32 %v1395_v14, %v1396_v57  ;;  %v1315_v48 = vmul.f32 %v2862_v39, %v1261_v43  ;;  %v2952_v12 = vpop.f32.mrb[21].mxu1  ;;  %v1263_v56 = vmax.f32 %v1101_v9, 0.0 }
 0x2df   : > { %v1424_v52 = vrot.slane %v1423_v53, 2  ;;  %v1401_v62 = vrot.slane %v1400_v54, 4  ;;  %v1264_v40 = vmax.f32 %v1103_v5, 0.0  ;;  %v2954_v41 = vpop.f32.mrb[22].mxu1  ;;  %v1274_v37 = vmax.f32 %v1220_v49, 0.0 }
 0x2e0   : > { %v1518_v58 = vpack.c.bf16 %v1392_v51, %v1392_v51  ;;  %v1398_v10 = vrot.slane %v1397_v2, 1  ;;  %v1212_v46 = vadd.f32 %v1211_v38, %v2846_v36  ;;  %v2957_v33 = vpop.f32.mrb[28].mxu0  ;;  %v2959_v35 = vpop.f32.mrb[23].mxu1  ;;  %v1317_v28 = vmul.f32 %v2856_v50, %v1263_v56 }
 0x2e1   : > { %v1425_v3 = vmax.f32 %v1423_v53, %v1424_v52  ;;  %v1402_v18 = vmax.f32 %v1400_v54, %v1401_v62  ;;  %v1318_v30 = vmul.f32 %v2867_v11, %v1264_v40  ;;  %v2963_v31 = vpop.f32.mrb[29].mxu0  ;;  %v1328_v21 = vmul.f32 %v2879_v20, %v1274_v37 }
 0x2e2   : > { %v1621_v22 = vunpack.c.l.b16 %v1518_v58  ;;  %v2965_v25 = vmax.f32 %v1397_v2, %v1398_v10  ;;  %v1268_v6 = vmax.f32 %v1212_v46, 0.0  ;;  %v2967_v45 = vpop.f32.mrb[30].mxu0  ;;  %v1407_v0 = vmax.f32 %v1314_v17, %v1317_v28 }
 0x2e3   : > { %v1426_v15 = vrot.slane %v1425_v3, 1  ;;  %v1403_v38 = vrot.slane %v1402_v18, 2  ;;  %v1414_v19 = vmax.f32 %v1315_v48, %v1318_v30  ;;  %v2969_v32 = vpop.f32.mrb[31].mxu0  ;;  %v1107_v14 = vadd.f32 %v2918_v13, %v2835_v47 }
 0x2e4   : > { %v2972_v29 = vsel %vm1641_vm0, %v1621_v22, %v1640_v34  ;;  %v1519_v61 = vpack.c.bf16 %v2965_v25, %v2965_v25  ;;  %v1408_v16 = vrot.slane %v1407_v0, 4  ;;  %v1322_v57 = vmul.f32 %v2879_v20, %v1268_v6 }
 0x2e5   : > { %v1427_v23 = vmax.f32 %v1425_v3, %v1426_v15  ;;  %v1404_v26 = vmax.f32 %v1402_v18, %v1403_v38  ;;  %v1415_v55 = vrot.slane %v1414_v19, 4  ;;  %v2979_v17 = vpop.f32.mrb[24].mxu1  ;;  %v1266_v43 = vmax.f32 %v1107_v14, 0.0 }
 0x2e6   : > { %v1223_v34 = vadd.f32 %v2920_v42, %v2846_v36  ;;  %v1109_v53 = vadd.f32 %v2922_v1, %v2839_v7  ;;  %v2986_v54 = vpop.f32.mrb[25].mxu1  ;;  %v1409_v5 = vmax.f32 %v1407_v0, %v1408_v16  ;;  %v1215_v62 = vadd.f32 %v2927_v44, %v2846_v36 }
 0x2e7   : > { %v1523_v9 = vpack.c.bf16 %v1427_v23, %v1427_v23  ;;  %v1405_v13 = vrot.slane %v1404_v26, 1  ;;  %v1416_v51 = vmax.f32 %v1414_v19, %v1415_v55  ;;  %v2988_v2 = vpop.f32.mrb[26].mxu1  ;;  %v1320_v48 = vmul.f32 %v2851_v4, %v1266_v43 }
 0x2e8   : > { %v1277_v49 = vmax.f32 %v1223_v34, 0.0  ;;  %v1267_v52 = vmax.f32 %v1109_v53, 0.0  ;;  %v2993_v56 = vpop.f32.mrb[27].mxu1  ;;  %v1410_v1 = vrot.slane %v1409_v5, 2  ;;  %v1271_v46 = vmax.f32 %v1215_v62, 0.0 }
 0x2e9   : > { %v1626_v42 = vunpack.c.l.b16 %v1523_v9  ;;  %v1406_v40 = vmax.f32 %v1404_v26, %v1405_v13  ;;  %v1417_v58 = vrot.slane %v1416_v51, 2  ;;  %v1111_v3 = vadd.f32 %v2929_v59, %v2835_v47 }
 0x2ea   : > { %v1331_v10 = vmul.f32 %v2886_v8, %v1277_v49  ;;  %v1321_v37 = vmul.f32 %v2862_v39, %v1267_v52  ;;  %v1411_v28 = vmax.f32 %v1409_v5, %v1410_v1  ;;  %v1113_v44 = vadd.f32 %v2934_v27, %v2839_v7 }
 0x2eb   : > { %v1520_v18 = vpack.c.bf16 %v1406_v40, %v1406_v40  ;;  %v1418_v30 = vmax.f32 %v1416_v51, %v1417_v58  ;;  %v1325_v25 = vmul.f32 %v2886_v8, %v1271_v46  ;;  %v1269_v6 = vmax.f32 %v1111_v3, 0.0 }
 0x2ec   : > { %v1463_v22 = vmax.f32 %v1328_v21, %v1331_v10  ;;  %v1117_v15 = vadd.f32 %v2948_v63, %v2835_v47  ;;  %v1412_v0 = vrot.slane %v1411_v28, 1  ;;  %v1270_v14 = vmax.f32 %v1113_v44, 0.0 }
 0x2ed   : > { %v1623_v38 = vunpack.c.l.b16 %v1520_v18  ;;  %v1419_v19 = vrot.slane %v1418_v30, 1  ;;  %v3004_v23 = vpop.f32.mrb[28].mxu1  ;;  %v1442_v26 = vmax.f32 %v1322_v57, %v1325_v25  ;;  %v1323_v16 = vmul.f32 %v2856_v50, %v1269_v6 }
 0x2ee   : > { %v1464_v59 = vrot.slane %v1463_v22, 4  ;;  %v1272_v55 = vmax.f32 %v1117_v15, 0.0  ;;  %v3007_v43 = vpop.f32.mrb[29].mxu1  ;;  %v1413_v21 = vmax.f32 %v1411_v28, %v1412_v0  ;;  %v1324_v63 = vmul.f32 %v2867_v11, %v1270_v14 }
 0x2ef   : > { %v1661_v27 = vsel %vm1641_vm0, %v1623_v38, %v2932_v24  ;;  %v1420_v34 = vmax.f32 %v1418_v30, %v1419_v19  ;;  %v3012_v53 = vpop.f32.mrb[30].mxu1  ;;  %v1443_v13 = vrot.slane %v1442_v26, 4  ;;  %v1428_v57 = vmax.f32 %v1320_v48, %v1323_v16 }
 0x2f0   : > { %v1465_v9 = vmax.f32 %v1463_v22, %v1464_v59  ;;  %v3015_v5 = vsel %vm1643_vm1, %v1626_v42, %v1661_v27  ;;  %v3017_v51 = vpop.f32.mrb[31].mxu1  ;;  %v3019_v49 = vunpack.c.l.b16 %v1519_v61  ;;  %v1521_v52 = vpack.c.bf16 %v1413_v21, %v1413_v21 }
 0x2f1   : > { %v1522_v62 = vpack.c.bf16 %v1420_v34, %v1420_v34  ;;  %v1435_v40 = vmax.f32 %v1321_v37, %v1324_v63  ;;  %v1444_v1 = vmax.f32 %v1442_v26, %v1443_v13  ;;  %v1429_v58 = vrot.slane %v1428_v57, 4 }
 0x2f2   : > { %v1466_v24 = vrot.slane %v1465_v9, 2  ;;  %v1119_v10 = vadd.f32 %v2952_v12, %v2839_v7  ;;  %v1624_v46 = vunpack.c.l.b16 %v1521_v52  ;;  %v1326_v18 = vmul.f32 %v2851_v4, %v1272_v55 }
 0x2f3   : > { %v1436_v3 = vrot.slane %v1435_v40, 4  ;;  %v1121_v48 = vadd.f32 %v2954_v41, %v2835_v47  ;;  %v1445_v28 = vrot.slane %v1444_v1, 2  ;;  %v1430_v61 = vmax.f32 %v1428_v57, %v1429_v58 }
 0x2f4   : > { %v1467_v42 = vmax.f32 %v1465_v9, %v1466_v24  ;;  %v1273_v30 = vmax.f32 %v1119_v10, 0.0  ;;  %v1644_v37 = vsel %vm1643_vm1, %v1624_v46, %v2972_v29  ;;  %v1236_v12 = vadd.f32 %v2957_v33, %v2846_v36 }
 0x2f5   : > { %v1437_v44 = vmax.f32 %v1435_v40, %v1436_v3  ;;  %v1275_v22 = vmax.f32 %v1121_v48, 0.0  ;;  %v3030_v25 = vunpack.c.l.b16 %v1522_v62  ;;  %v1446_v15 = vmax.f32 %v1444_v1, %v1445_v28 }
 0x2f6   : > { %v1468_v6 = vrot.slane %v1467_v42, 1  ;;  %v1431_v38 = vrot.slane %v1430_v61, 2  ;;  %v1286_v19 = vmax.f32 %v1236_v12, 0.0  ;;  %v1123_v14 = vadd.f32 %v2959_v35, %v2839_v7 }
 0x2f7   : > { %v1438_v0 = vrot.slane %v1437_v44, 2  ;;  %v1329_v41 = vmul.f32 %v2856_v50, %v1275_v22  ;;  %v1447_v29 = vrot.slane %v1446_v15, 1  ;;  %v1228_v16 = vadd.f32 %v2963_v31, %v2846_v36 }
 0x2f8   : > { %v1469_v59 = vmax.f32 %v1467_v42, %v1468_v6  ;;  %v1432_v26 = vmax.f32 %v1430_v61, %v1431_v38  ;;  %v1327_v33 = vmul.f32 %v2862_v39, %v1273_v30  ;;  %v1276_v21 = vmax.f32 %v1123_v14, 0.0 }
 0x2f9   : > { %v1439_v55 = vmax.f32 %v1437_v44, %v1438_v0  ;;  %v1449_v27 = vmax.f32 %v1326_v18, %v1329_v41  ;;  %v1448_v63 = vmax.f32 %v1446_v15, %v1447_v29  ;;  %v1340_v13 = vmul.f32 %v2879_v20, %v1286_v19 }
 0x2fa   : > { %v1529_v34 = vpack.c.bf16 %v1469_v59, %v1469_v59  ;;  %v1433_v9 = vrot.slane %v1432_v26, 1  ;;  %v1330_v35 = vmul.f32 %v2867_v11, %v1276_v21  ;;  %v1239_v62 = vadd.f32 %v2967_v45, %v2846_v36 }
 0x2fb   : > { %v1440_v57 = vrot.slane %v1439_v55, 1  ;;  %v1450_v52 = vrot.slane %v1449_v27, 4  ;;  %v1526_v31 = vpack.c.bf16 %v1448_v63, %v1448_v63  ;;  %v1280_v1 = vmax.f32 %v1228_v16, 0.0 }
 0x2fc   : > { %v3042_v40 = vunpack.c.l.b16 %v1529_v34  ;;  %v1434_v24 = vmax.f32 %v1432_v26, %v1433_v9  ;;  %v1456_v46 = vmax.f32 %v1327_v33, %v1330_v35  ;;  %v1289_v3 = vmax.f32 %v1239_v62, 0.0 }
 0x2fd   : > { %v1441_v58 = vmax.f32 %v1439_v55, %v1440_v57  ;;  %v1451_v10 = vmax.f32 %v1449_v27, %v1450_v52  ;;  %v1629_v18 = vunpack.c.l.b16 %v1526_v31  ;;  %v1231_v42 = vadd.f32 %v2969_v32, %v2846_v36 }
 0x2fe   : > { %v1524_v48 = vpack.c.bf16 %v1434_v24, %v1434_v24  ;;  %v1127_v28 = vadd.f32 %v2979_v17, %v2835_v47  ;;  %v1457_v45 = vrot.slane %v1456_v46, 4  ;;  %v1343_v44 = vmul.f32 %v2886_v8, %v1289_v3 }
 0x2ff   : > { %v1525_v61 = vpack.c.bf16 %v1441_v58, %v1441_v58  ;;  %v1452_v30 = vrot.slane %v1451_v10, 2  ;;  %v1663_v22 = vsel %vm1645_vm2, %v1629_v18, %v3015_v5  ;;  %v1334_v6 = vmul.f32 %v2879_v20, %v1280_v1 }
 0x300   : > { %v1627_v12 = vunpack.c.l.b16 %v1524_v48  ;;  %v1283_v15 = vmax.f32 %v1231_v42, 0.0  ;;  %v1458_v0 = vmax.f32 %v1456_v46, %v1457_v45  ;;  %v1505_v41 = vmax.f32 %v1340_v13, %v1343_v44 }
 0x301   : > { %v1453_v38 = vmax.f32 %v1451_v10, %v1452_v30  ;;  %v1278_v19 = vmax.f32 %v1127_v28, 0.0  ;;  %v3053_v32 = vunpack.c.l.b16 %v1525_v61  ;;  %v1129_v14 = vadd.f32 %v2986_v54, %v2839_v7 }
 0x302   : > { %v1646_v36 = vsel %vm1645_vm2, %v1627_v12, %v1644_v37  ;;  %v1337_v17 = vmul.f32 %v2886_v8, %v1283_v15  ;;  %v1459_v5 = vrot.slane %v1458_v0, 2  ;;  %v1506_v29 = vrot.slane %v1505_v41, 4 }
 0x303   : > { %v1454_v59 = vrot.slane %v1453_v38, 1  ;;  %v1131_v20 = vadd.f32 %v2988_v2, %v2835_v47  ;;  %v1279_v16 = vmax.f32 %v1129_v14, 0.0  ;;  %v1133_v55 = vadd.f32 %v2993_v56, %v2839_v7 }
 0x304   : > { %v1484_v26 = vmax.f32 %v1334_v6, %v1337_v17  ;;  %v1137_v37 = vadd.f32 %v3004_v23, %v2835_v47  ;;  %v1460_v27 = vmax.f32 %v1458_v0, %v1459_v5  ;;  %v1507_v8 = vmax.f32 %v1505_v41, %v1506_v29 }
 0x305   : > { %v1455_v33 = vmax.f32 %v1453_v38, %v1454_v59  ;;  %v1281_v21 = vmax.f32 %v1131_v20, 0.0  ;;  %v1332_v54 = vmul.f32 %v2851_v4, %v1278_v19  ;;  %v1333_v63 = vmul.f32 %v2862_v39, %v1279_v16 }
 0x306   : > { %v1485_v34 = vrot.slane %v1484_v26, 4  ;;  %v1282_v9 = vmax.f32 %v1133_v55, 0.0  ;;  %v1461_v2 = vrot.slane %v1460_v27, 1  ;;  %v1508_v57 = vrot.slane %v1507_v8, 2 }
 0x307   : > { %v1527_v13 = vpack.c.bf16 %v1455_v33, %v1455_v33  ;;  %v1335_v52 = vmul.f32 %v2856_v50, %v1281_v21  ;;  %v1284_v62 = vmax.f32 %v1137_v37, 0.0  ;;  %v1139_v23 = vadd.f32 %v3007_v43, %v2839_v7 }
 0x308   : > { %v1486_v35 = vmax.f32 %v1484_v26, %v1485_v34  ;;  %v1336_v56 = vmul.f32 %v2867_v11, %v1282_v9  ;;  %v1462_v24 = vmax.f32 %v1460_v27, %v1461_v2  ;;  %v1509_v1 = vmax.f32 %v1507_v8, %v1508_v57 }
 0x309   : > { %v1630_v31 = vunpack.c.l.b16 %v1527_v13  ;;  %v1470_v58 = vmax.f32 %v1332_v54, %v1335_v52  ;;  %v1285_v3 = vmax.f32 %v1139_v23, 0.0  ;;  %v1141_v18 = vadd.f32 %v3012_v53, %v2835_v47 }
 0x30a   : > { %v1487_v10 = vrot.slane %v1486_v35, 2  ;;  %v1477_v46 = vmax.f32 %v1333_v63, %v1336_v56  ;;  %v1528_v42 = vpack.c.bf16 %v1462_v24, %v1462_v24  ;;  %v1510_v28 = vrot.slane %v1509_v1, 1 }
 0x30b   : > { %v1648_v48 = vsel %vm1647_vm3, %v1630_v31, %v1646_v36  ;;  %v1471_v61 = vrot.slane %v1470_v58, 4  ;;  %v1338_v44 = vmul.f32 %v2851_v4, %v1284_v62  ;;  %v1287_v43 = vmax.f32 %v1141_v18, 0.0 }
 0x30c   : > { %v1488_v30 = vmax.f32 %v1486_v35, %v1487_v10  ;;  %v1478_v45 = vrot.slane %v1477_v46, 4  ;;  %v1631_v12 = vunpack.c.l.b16 %v1528_v42  ;;  %v1511_v6 = vmax.f32 %v1509_v1, %v1510_v28 }
 0x30d   : > { %v1472_v15 = vmax.f32 %v1470_v58, %v1471_v61  ;;  %v1143_v38 = vadd.f32 %v3017_v51, %v2839_v7  ;;  %v1341_v47 = vmul.f32 %v2856_v50, %v1287_v43  ;;  %v1664_v53 = vsel %vm1647_vm3, %v3042_v40, %v1663_v22 }
 0x30e   : > { %v1489_v0 = vrot.slane %v1488_v30, 1  ;;  %v1479_v41 = vmax.f32 %v1477_v46, %v1478_v45  ;;  %v1339_v36 = vmul.f32 %v2862_v39, %v1285_v3  ;;  %v1654_v4 = vsel %vm1641_vm0, %v3019_v49, %v2943_v60 }
 0x30f   : > { %v1473_v19 = vrot.slane %v1472_v15, 2  ;;  %v1288_v17 = vmax.f32 %v1143_v38, 0.0  ;;  %v1491_v5 = vmax.f32 %v1338_v44, %v1341_v47  ;;  %v1655_v7 = vsel %vm1643_vm1, %v3030_v25, %v1654_v4 }
 0x310   : > { %v1490_v14 = vmax.f32 %v1488_v30, %v1489_v0  ;;  %v1480_v59 = vrot.slane %v1479_v41, 2  ;;  %v1535_v51 = vpack.c.bf16 %v1511_v6, %v1511_v6  ;;  %v1656_v40 = vsel %vm1645_vm2, %v3053_v32, %v1655_v7 }
 0x311   : > { %v1474_v29 = vmax.f32 %v1472_v15, %v1473_v19  ;;  %v1342_v50 = vmul.f32 %v2867_v11, %v1288_v17  ;;  %v1492_v20 = vrot.slane %v1491_v5, 4  ;;  %v1657_v26 = vsel %vm1647_vm3, %v1631_v12, %v1656_v40  ;;  %v2023_v12 = vld [vmem:[%s3111_s6] ss:$0 sm:$0xff] }
 0x312   : > { %v1532_v22 = vpack.c.bf16 %v1490_v14, %v1490_v14  ;;  %v1481_v39 = vmax.f32 %v1479_v41, %v1480_v59  ;;  %v1638_v25 = vunpack.c.l.b16 %v1535_v51 }
 0x313   : > { %v1475_v16 = vrot.slane %v1474_v29, 1  ;;  %v1498_v60 = vmax.f32 %v1339_v36, %v1342_v50  ;;  %v1493_v37 = vmax.f32 %v1491_v5, %v1492_v20 }
 0x314   : > { %v1635_v49 = vunpack.c.l.b16 %v1532_v22  ;;  %v1482_v55 = vrot.slane %v1481_v39, 1 }
 0x315   : > { %v1476_v33 = vmax.f32 %v1474_v29, %v1475_v16  ;;  %v1499_v27 = vrot.slane %v1498_v60, 4  ;;  %v1494_v11 = vrot.slane %v1493_v37, 2 }
 0x316   : > { %v1483_v8 = vmax.f32 %v1481_v39, %v1482_v55  ;;  %v1665_v21 = vsel %vm1649_vm4, %v1635_v49, %v1664_v53 }
 0x317   : > { %v1530_v32 = vpack.c.bf16 %v1476_v33, %v1476_v33  ;;  %v1500_v34 = vmax.f32 %v1498_v60, %v1499_v27  ;;  %v1666_v54 = vsel %vm1651_vm5, %v1638_v25, %v1665_v21  ;;  %v1495_v63 = vmax.f32 %v1493_v37, %v1494_v11 }
 0x318   : > { %v1669_v9 = vpack.c.b16 %v1666_v54, %v1666_v54  ;;  %v1531_v13 = vpack.c.bf16 %v1483_v8, %v1483_v8 }
 0x319   : > { %v1633_v2 = vunpack.c.l.b16 %v1530_v32  ;;  %v1501_v57 = vrot.slane %v1500_v34, 2  ;;  %v1496_v52 = vrot.slane %v1495_v63, 1 }
 0x31a   : > { %2194 = vmatmul.mubr.bf16.vlgmr.msra.gmra.mrb[32].mxu1 %v1669_v9  ;;  %v1634_v35 = vunpack.c.l.b16 %v1531_v13 }
 0x31b   : > { %v1502_v56 = vmax.f32 %v1500_v34, %v1501_v57  ;;  %v1650_v62 = vsel %vm1649_vm4, %v1633_v2, %v1648_v48  ;;  %v1497_v23 = vmax.f32 %v1495_v63, %v1496_v52 }
 0x31c   : > { %v1658_v31 = vsel %vm1649_vm4, %v1634_v35, %v1657_v26 }
 0x31d   : > { %v1503_v24 = vrot.slane %v1502_v56, 1  ;;  %v1533_v1 = vpack.c.bf16 %v1497_v23, %v1497_v23 }
 0x31f   : > { %v1504_v58 = vmax.f32 %v1502_v56, %v1503_v24  ;;  %v1636_v10 = vunpack.c.l.b16 %v1533_v1 }
 0x321   : > { %v1534_v46 = vpack.c.bf16 %v1504_v58, %v1504_v58  ;;  %v1652_v3 = vsel %vm1651_vm5, %v1636_v10, %v1650_v62 }
 0x322   : > { %v1667_v61 = vpack.c.b16 %v1652_v3, %v1652_v3 }
 0x323   : > { %v1637_v18 = vunpack.c.l.b16 %v1534_v46 }
 0x325   : > { %v1659_v42 = vsel %vm1651_vm5, %v1637_v18, %v1658_v31 }
 0x326   : > { %v1668_v28 = vpack.c.b16 %v1659_v42, %v1659_v42 }
 0x328   : > { %1849 = vmatprep.mubr.bf16.mxu0 %v1668_v28 }
 0x329   : > { %1850 = vmatmul.mubr.bf16.vlgmr.msra.gmra.mrb[32].mxu0 %v1667_v61 }
 0x3ed   : > { %v1891_v30 = vpop.f32.mrb[32].mxu1 }
 0x3ee   : > { %v2195_v48 = vpop.f32.mrb[33].mxu1 }
 0x3ef   : > { %v1894_v45 = vpop.f32.mrb[34].mxu1 }
 0x3f0   : > { %v2196_v44 = vpop.f32.mrb[35].mxu1 }
 0x3fc   : > { %v2098_v43 = vpop.f32.mrb[32].mxu0 }
 0x3fd   : > { %v2099_v6 = vpop.f32.mrb[33].mxu0 }
 0x3fe   : > { %v2100_v15 = vadd.f32 %v2099_v6, %v2098_v43  ;;  %v2101_v38 = vpop.f32.mrb[34].mxu0 }
 0x3ff   : > { %v2102_v0 = vpop.f32.mrb[35].mxu0 }
 0x400   : > { %v1852_v41 = vadd.f32 %v2100_v15, %v2023_v12 }
 0x402   : > { %v1892_v47 = vadd.f32 %v1891_v30, %v1852_v41 }
 0x404   : > { %v1897_v53 = vpack.c.bf16 %v1892_v47, %v1892_v47 }
 0x406   : > { %1898 = vst [vmem:[%s273_s15] sm:$0xf] %v1897_v53 }
 0x407 PF: > { %s17_s24 = sadd.s32 1, %s2282_s24  }
 0x408   : > { %p14_p4 = scmp.ge.s32.totalorder %s17_s24, 4  }
 0x40a   :  { %16 = sbr.rel (!%p14_p4) target bundleno = 1 (0x1), region = 78 }

</bundles_post_ra>
